<compile_context>
chip_gen: v5e
topology: v5e:2x2
jax: 0.10.0
libtpu: 0.0.40
codegen_flags: <defaults>
</compile_context>

<pallas_src>
import numpy as np

import jax
import jax.numpy as jnp
from jax.experimental import pallas as pl
from jax.experimental.pallas import tpu as pltpu

EPS = 1e-9

# ----------------------------- model config ---------------------------------
B = 2
C_IN = 4
T = 16
C_OUT = 8
N_CONV_BLOCKS = 2
N_DENSE_BLOCKS = 2
CONV_BANK_SCALE = 2
MAX_BANK_WIDTH = 4          # bank widths: 2, 4
C_BANK = 4
C_H = 32
KERNEL_SIZE = 3
STRIDE_LIST = (1, 2)
# activation_layer == nn.ReLU(); dropout == identity (eval); batchnorm unused.

BANK_WIDTHS = tuple(range(CONV_BANK_SCALE, MAX_BANK_WIDTH + 1, CONV_BANK_SCALE))
N_BANKS = len(BANK_WIDTHS)
N_TAPS = sum(BANK_WIDTHS)                 # total conv-bank taps (6)
C_CAT = N_BANKS * C_BANK + C_IN           # bottleneck input channels (12)


def _time_lengths():
    ts = [T]
    t = T
    for s in STRIDE_LIST[:N_CONV_BLOCKS]:
        t = (t - 1) // s + 1              # reflect pad keeps length; stride -> ceil(t/s)
        ts.append(t)
    return ts


TIME_LENGTHS = _time_lengths()
T_FINAL = TIME_LENGTHS[-1]

# ----------------------------- slab layout -----------------------------------
SLAB_WIDTH = 128                          # one lane-tile wide -> lane-aligned loads

# Packed bias / pooling-vector columns inside the "bias" slab entry.
_BCOL_BANK = 0
_BCOL_BNECK = 1
_BCOL_CONV0 = 2                                   # conv block i: first 2+2i, second 3+2i
_BCOL_DENSE0 = _BCOL_CONV0 + 2 * N_CONV_BLOCKS    # dense block i: first +2i, second +2i+1
_BCOL_OUT = _BCOL_DENSE0 + 2 * N_DENSE_BLOCKS
_BCOL_MEAN = _BCOL_OUT + 1
N_BIAS_COLS = _BCOL_MEAN + 1

assert KERNEL_SIZE == 3, "conv GEMM split below assumes k == 3"
assert 2 * B * C_H <= SLAB_WIDTH
assert N_TAPS * B * C_IN <= SLAB_WIDTH
assert B * C_CAT <= SLAB_WIDTH
assert N_BIAS_COLS <= SLAB_WIDTH


def _build_layout():
    """Static row offsets of every packed operand inside the weight slab."""
    entries = {}
    row = [0]

    def add(name, r, c):
        assert c <= SLAB_WIDTH, (name, c)
        entries[name] = (row[0], r, c)
        row[0] += -(-r // 8) * 8          # keep every entry sublane (8-row) aligned

    add("bank_R", N_TAPS * T, T)                                  # stacked time ops
    add("bank_W", B * N_BANKS * C_BANK, N_TAPS * B * C_IN)
    add("bneck_W", B * C_H, B * C_CAT)
    for i in range(N_CONV_BLOCKS):
        ti, tn = TIME_LENGTHS[i], TIME_LENGTHS[i + 1]
        add(f"blk{i}_R1", KERNEL_SIZE * ti, ti)
        add(f"blk{i}_R2", KERNEL_SIZE * ti, tn)
        add(f"blk{i}_W1a", B * C_H, 2 * B * C_H)                  # taps 0,1 (128 lanes)
        add(f"blk{i}_W1b", B * C_H, B * C_H)                      # tap 2
        add(f"blk{i}_W2a", B * C_H, 2 * B * C_H)
        add(f"blk{i}_W2b", B * C_H, B * C_H)
        if STRIDE_LIST[i] > 1:
            add(f"blk{i}_pool", ti, tn)
    for i in range(N_DENSE_BLOCKS):
        add(f"dense{i}_W1", B * C_H, B * C_H)
        add(f"dense{i}_W2", B * C_H, B * C_H)
    add("out_W", B * C_OUT, B * C_H)
    add("bias", B * C_H, N_BIAS_COLS)
    return entries, row[0]


_SLAB, _SLAB_ROWS = _build_layout()


def _flops_estimate():
    m = 0
    m += N_TAPS * (B * C_IN) * T * T
    m += (B * N_BANKS * C_BANK) * (N_TAPS * B * C_IN) * T
    m += (B * C_H) * (B * C_CAT) * T
    for i in range(N_CONV_BLOCKS):
        ti, tn = TIME_LENGTHS[i], TIME_LENGTHS[i + 1]
        m += KERNEL_SIZE * (B * C_H) * ti * ti
        m += (B * C_H) * (KERNEL_SIZE * B * C_H) * ti
        m += KERNEL_SIZE * (B * C_H) * ti * tn
        m += (B * C_H) * (KERNEL_SIZE * B * C_H) * tn
        if STRIDE_LIST[i] > 1:
            m += (B * C_H) * ti * tn
    m += (B * C_H) * T_FINAL
    m += N_DENSE_BLOCKS * 2 * (B * C_H) * (B * C_H)
    m += (B * C_OUT) * (B * C_H)
    return 2 * m


_FLOPS_ESTIMATE = _flops_estimate()


# ----------------------- host-side operator construction ---------------------
def _reflect_indices(t, pad_l, pad_r):
    """Source indices of a PyTorch 'reflect'-padded length-t sequence."""
    idx = np.arange(-pad_l, t + pad_r)
    idx = np.abs(idx)                                   # left reflection
    idx = np.where(idx >= t, 2 * (t - 1) - idx, idx)    # right reflection
    return idx


def _conv_time_right_ops(t_in, k, stride):
    """Per-tap right-multiply 0/1 time operators folding pad_input() reflect
    padding and stride: conv(h)[.., t] uses (h @ R_tau)[.., t] = h[.., idx]."""
    if k % 2 == 0:
        pad_l, pad_r = k // 2, k // 2 - 1
    else:
        pad_l, pad_r = k // 2, k // 2
    idx = _reflect_indices(t_in, pad_l, pad_r)
    t_out = (t_in + pad_l + pad_r - k) // stride + 1
    r = np.zeros((k, t_in, t_out), np.float32)
    for tau in range(k):
        for j in range(t_out):
            r[tau, idx[j * stride + tau], j] = 1.0
    return r, t_out


def _avg_pool_right_op(t_in, k):
    """F.avg_pool1d(kernel_size=k, ceil_mode=True) as a right-multiply matrix."""
    t_out = -(-t_in // k)
    p = np.zeros((t_in, t_out), np.float32)
    for j in range(t_out):
        s, e = j * k, min(j * k + k, t_in)
        p[s:e, j] = 1.0 / (e - s)
    return p, t_out


# ----------------------------- fused Pallas kernel ---------------------------
def _fused_forward_kernel(x_ref, slab_ref, out_ref):
    """Entire SpeakerEncoder forward in channel-major layout (rows = b*C + c,
    cols = time); all weights/operators read from one VMEM-resident slab."""
    f32 = jnp.float32

    def ld(name):
        r0, r, c = _SLAB[name]
        return slab_ref[r0:r0 + r, 0:c]

    def ld_tap(name, tau, rows, cols):
        r0, _, _ = _SLAB[name]
        return slab_ref[r0 + tau * rows:r0 + (tau + 1) * rows, 0:cols]

    def bias_col(col, rows):
        r0, _, _ = _SLAB["bias"]
        return slab_ref[r0:r0 + rows, col:col + 1]

    def dot(a, b):
        return jnp.dot(a, b, preferred_element_type=f32)

    def conv(h, rname, waname, wbname, bcol, t_in, t_out):
        # Conv1d(+reflect pad, stride): k independent time-shift GEMMs feeding
        # one wide channel-mixing GEMM (split in two to stay <= 128 lanes).
        p = [dot(h, ld_tap(rname, tau, t_in, t_out)) for tau in range(KERNEL_SIZE)]
        y = (dot(ld(waname), jnp.concatenate(p[:2], axis=0))
             + dot(ld(wbname), p[2]))
        return jnp.maximum(y + bias_col(bcol, B * C_H), 0.0)

    # ---- log(x + eps); activations stay channel-major --------------------------
    x2 = jnp.log(x_ref[...].astype(f32) + EPS)                       # (B*C_IN, T)

    # ---- conv banks: all taps of both banks feed ONE block-structured GEMM -----
    taps = [dot(x2, ld_tap("bank_R", tap, T, T)) for tap in range(N_TAPS)]
    patches = jnp.concatenate(taps, axis=0)                          # (N_TAPS*B*C_IN, T)
    bank = jnp.maximum(dot(ld("bank_W"), patches)
                       + bias_col(_BCOL_BANK, B * N_BANKS * C_BANK), 0.0)

    # ---- 1x1 bottleneck; channel concat [bank0, bank1, x] folded into weight ---
    h = jnp.maximum(dot(ld("bneck_W"), jnp.concatenate([bank, x2], axis=0))
                    + bias_col(_BCOL_BNECK, B * C_H), 0.0)           # (B*C_H, T)

    # ---- conv blocks with residual (ceil-mode avg-pool on the skip path) -------
    for i in range(N_CONV_BLOCKS):
        ti, tn = TIME_LENGTHS[i], TIME_LENGTHS[i + 1]
        y = conv(h, f"blk{i}_R1", f"blk{i}_W1a", f"blk{i}_W1b",
                 _BCOL_CONV0 + 2 * i, ti, ti)
        y = conv(y, f"blk{i}_R2", f"blk{i}_W2a", f"blk{i}_W2b",
                 _BCOL_CONV0 + 2 * i + 1, ti, tn)
        if STRIDE_LIST[i] > 1:
            h = dot(h, ld(f"blk{i}_pool"))
        h = h + y

    # ---- global average pooling over time (AdaptiveAvgPool1d(1)) ---------------
    v = dot(h, bias_col(_BCOL_MEAN, T_FINAL))                        # (B*C_H, 1)

    # ---- dense blocks with residual ---------------------------------------------
    for i in range(N_DENSE_BLOCKS):
        y = jnp.maximum(dot(ld(f"dense{i}_W1"), v)
                        + bias_col(_BCOL_DENSE0 + 2 * i, B * C_H), 0.0)
        y = jnp.maximum(dot(ld(f"dense{i}_W2"), y)
                        + bias_col(_BCOL_DENSE0 + 2 * i + 1, B * C_H), 0.0)
        v = v + y

    # ---- output affine (no activation) ------------------------------------------
    out = dot(ld("out_W"), v) + bias_col(_BCOL_OUT, B * C_OUT)       # (B*C_OUT, 1)
    out_ref[...] = out.astype(out_ref.dtype)


# ----------------------------- parameter packing -----------------------------
def pack_params(params):
    """One-time repack of PyTorch-layout params into a single tile-aligned f32
    slab: GEMM-layout weights (with batch kron structure) + precomputed
    reflect/stride/pool time operators + packed bias/mean columns."""
    eye_b = np.eye(B, dtype=np.float32)
    slab = np.zeros((_SLAB_ROWS, SLAB_WIDTH), np.float32)

    def put(name, mat):
        r0, r, c = _SLAB[name]
        mat = np.asarray(mat, np.float32)
        assert mat.shape == (r, c), (name, mat.shape, (r, c))
        slab[r0:r0 + r, 0:c] = mat

    # --- conv banks: stacked time operators + one block-structured weight ------
    bank_r = []
    bank_w = np.zeros((B * N_BANKS * C_BANK, N_TAPS * B * C_IN), np.float32)
    bank_bias = np.zeros((B * N_BANKS * C_BANK,), np.float32)
    tap = 0
    for bi, ((w, b), k) in enumerate(zip(params["banks"], BANK_WIDTHS)):
        w = np.asarray(w, np.float32)                   # (C_BANK, C_IN, k)
        r_ops, t_out = _conv_time_right_ops(T, k, 1)
        assert t_out == T
        for tau in range(k):
            bank_r.append(r_ops[tau])
            blk = np.zeros((N_BANKS * C_BANK, C_IN), np.float32)
            blk[bi * C_BANK:(bi + 1) * C_BANK, :] = w[:, :, tau]
            bank_w[:, tap * B * C_IN:(tap + 1) * B * C_IN] = np.kron(eye_b, blk)
            tap += 1
        for bb_ in range(B):
            lo = bb_ * N_BANKS * C_BANK + bi * C_BANK
            bank_bias[lo:lo + C_BANK] = np.asarray(b, np.float32)
    put("bank_R", np.concatenate(bank_r, axis=0))
    put("bank_W", bank_w)

    # --- 1x1 bottleneck (channel concat [bank0, bank1, x] folded in) -----------
    wb, bb = params["bottleneck"]
    wb2 = np.asarray(wb, np.float32)[:, :, 0]           # (C_H, C_CAT)
    put("bneck_W", np.concatenate(
        [np.kron(eye_b, wb2[:, :N_BANKS * C_BANK]),
         np.kron(eye_b, wb2[:, N_BANKS * C_BANK:])], axis=1))

    # --- conv blocks -------------------------------------------------------------
    conv_biases = []
    for i in range(N_CONV_BLOCKS):
        ti = TIME_LENGTHS[i]
        s = STRIDE_LIST[i]
        r1, t_same = _conv_time_right_ops(ti, KERNEL_SIZE, 1)
        r2, t_next = _conv_time_right_ops(ti, KERNEL_SIZE, s)
        assert t_same == ti and t_next == TIME_LENGTHS[i + 1]
        put(f"blk{i}_R1", np.concatenate(list(r1), axis=0))
        put(f"blk{i}_R2", np.concatenate(list(r2), axis=0))
        for tag, (w, b) in (("1", params["conv_first"][i]),
                            ("2", params["conv_second"][i])):
            w = np.asarray(w, np.float32)               # (C_H, C_H, k)
            kr = [np.kron(eye_b, w[:, :, tau]) for tau in range(KERNEL_SIZE)]
            put(f"blk{i}_W{tag}a", np.concatenate(kr[:2], axis=1))
            put(f"blk{i}_W{tag}b", kr[2])
            conv_biases.append(np.tile(np.asarray(b, np.float32), B))
        if s > 1:
            put(f"blk{i}_pool", _avg_pool_right_op(ti, s)[0])

    # --- dense blocks + output affine --------------------------------------------
    dense_biases = []
    for i in range(N_DENSE_BLOCKS):
        for tag, (w, b) in (("1", params["dense_first"][i]),
                            ("2", params["dense_second"][i])):
            put(f"dense{i}_W{tag}", np.kron(eye_b, np.asarray(w, np.float32)))
            dense_biases.append(np.tile(np.asarray(b, np.float32), B))
    wo, bo = params["affine_out"]
    put("out_W", np.kron(eye_b, np.asarray(wo, np.float32)))

    # --- packed bias / global-mean columns -----------------------------------------
    bias_blk = np.zeros((B * C_H, N_BIAS_COLS), np.float32)
    bias_blk[:B * N_BANKS * C_BANK, _BCOL_BANK] = bank_bias
    bias_blk[:, _BCOL_BNECK] = np.tile(np.asarray(bb, np.float32), B)
    for j, v in enumerate(conv_biases):
        bias_blk[:, _BCOL_CONV0 + j] = v
    for j, v in enumerate(dense_biases):
        bias_blk[:, _BCOL_DENSE0 + j] = v
    bias_blk[:B * C_OUT, _BCOL_OUT] = np.tile(np.asarray(bo, np.float32), B)
    bias_blk[:T_FINAL, _BCOL_MEAN] = 1.0 / T_FINAL      # global-mean pooling vector
    put("bias", bias_blk)

    return jnp.asarray(slab)


# ----------------------------- forward pass ----------------------------------
def speaker_encoder_forward(slab, x_bct):
    """x_bct: (B, c_in, T) PyTorch NCL layout -> (B, c_out).  One pallas_call,
    no grid, no pipelining; both inputs live whole in VMEM."""
    x2 = x_bct.reshape(B * C_IN, T)       # contiguous reshape: free, no transpose HLO
    out = pl.pallas_call(
        _fused_forward_kernel,
        out_shape=jax.ShapeDtypeStruct((B * C_OUT, 1), jnp.float32),
        in_specs=[pl.BlockSpec(memory_space=pltpu.MemorySpace.VMEM),
                  pl.BlockSpec(memory_space=pltpu.MemorySpace.VMEM)],
        out_specs=pl.BlockSpec(memory_space=pltpu.MemorySpace.VMEM),
        cost_estimate=pl.CostEstimate(
            flops=_FLOPS_ESTIMATE,
            transcendentals=B * C_IN * T,
            bytes_accessed=4 * (_SLAB_ROWS * SLAB_WIDTH + B * C_IN * T + B * C_OUT)),
    )(x2, slab)
    return out.reshape(B, C_OUT)          # contiguous reshape: free


# ----------------------------- parameters ------------------------------------
def init_params(key):
    keys = iter(jax.random.split(key, 64))

    def mk(shape, fan_in):
        return (jax.random.normal(next(keys), shape, jnp.float32)
                / jnp.sqrt(float(fan_in))).astype(jnp.float32)

    params = {}
    params["banks"] = [
        (mk((C_BANK, C_IN, w), C_IN * w), mk((C_BANK,), C_IN * w))
        for w in BANK_WIDTHS
    ]
    params["bottleneck"] = (mk((C_H, C_CAT, 1), C_CAT), mk((C_H,), C_CAT))
    params["conv_first"] = [
        (mk((C_H, C_H, KERNEL_SIZE), C_H * KERNEL_SIZE), mk((C_H,), C_H * KERNEL_SIZE))
        for _ in range(N_CONV_BLOCKS)
    ]
    params["conv_second"] = [
        (mk((C_H, C_H, KERNEL_SIZE), C_H * KERNEL_SIZE), mk((C_H,), C_H * KERNEL_SIZE))
        for _ in range(N_CONV_BLOCKS)
    ]
    params["dense_first"] = [
        (mk((C_H, C_H), C_H), mk((C_H,), C_H)) for _ in range(N_DENSE_BLOCKS)
    ]
    params["dense_second"] = [
        (mk((C_H, C_H), C_H), mk((C_H,), C_H)) for _ in range(N_DENSE_BLOCKS)
    ]
    params["affine_out"] = (mk((C_OUT, C_H), C_H), mk((C_OUT,), C_H))
    return params


# ------------------------- independent numpy reference -----------------------
def _reference_forward_np(params, x_bct):
    """Float64 numpy reference of SpeakerEncoder.forward (eval mode)."""
    p = jax.tree_util.tree_map(lambda a: np.asarray(a, np.float64), params)
    x = np.asarray(x_bct, np.float64).transpose(0, 2, 1)          # (B, T, C)
    x = np.log(x + EPS)

    def reflect_pad(h, k):
        pad = (k // 2, k // 2 - 1) if k % 2 == 0 else (k // 2, k // 2)
        if pad == (0, 0):
            return h
        return np.pad(h, ((0, 0), pad, (0, 0)), mode="reflect")

    def conv1d(h, w, b, stride=1, relu=True):
        bb_, tp, cin = h.shape
        cout, _, k = w.shape
        t_out = (tp - k) // stride + 1
        idx = np.arange(t_out)[:, None] * stride + np.arange(k)[None, :]
        patches = h[:, idx, :].reshape(bb_, t_out, k * cin)
        w_gemm = w.transpose(2, 1, 0).reshape(k * cin, cout)
        y = patches @ w_gemm + b
        return np.maximum(y, 0.0) if relu else y

    def avg_pool_ceil(h, k):
        bb_, tt, cc = h.shape
        t_out = -(-tt // k)
        y = np.zeros((bb_, t_out, cc))
        for t in range(t_out):
            s, e = t * k, min(t * k + k, tt)
            y[:, t, :] = h[:, s:e, :].mean(axis=1)
        return y

    outs = [conv1d(reflect_pad(x, k), w, b)
            for (w, b), k in zip(p["banks"], BANK_WIDTHS)]
    outs.append(x)
    out = np.concatenate(outs, axis=-1)

    w, b = p["bottleneck"]
    out = conv1d(out, w, b)                                       # k=1, pad (0,0)

    for i in range(N_CONV_BLOCKS):
        w1, b1 = p["conv_first"][i]
        w2, b2 = p["conv_second"][i]
        s = STRIDE_LIST[i]
        y = conv1d(reflect_pad(out, KERNEL_SIZE), w1, b1)
        y = conv1d(reflect_pad(y, KERNEL_SIZE), w2, b2, stride=s)
        if s > 1:
            out = avg_pool_ceil(out, s)
        out = out + y

    out = out.mean(axis=1)                                        # (B, C_H)

    for i in range(N_DENSE_BLOCKS):
        w1, b1 = p["dense_first"][i]
        w2, b2 = p["dense_second"][i]
        y = np.maximum(out @ w1.T + b1, 0.0)
        y = np.maximum(y @ w2.T + b2, 0.0)
        out = out + y

    w, b = p["affine_out"]
    return out @ w.T + b


if __name__ == "__main__":
    key = jax.random.PRNGKey(0)
    k_x, k_p = jax.random.split(key)
    # spectrogram-like positive input (it is passed through log(x + eps))
    x = jax.random.uniform(k_x, (B, C_IN, T), jnp.float32, minval=0.0, maxval=1.0)
    params = init_params(k_p)
    slab = pack_params(params)            # one-time weight repack (not per call)

    fwd = jax.jit(speaker_encoder_forward)
    out = jax.block_until_ready(fwd(slab, x))
    assert out.shape == (B, C_OUT), out.shape
    assert bool(jnp.all(jnp.isfinite(out)))

    ref = _reference_forward_np(params, x)
    assert np.allclose(np.asarray(out, np.float64), ref, rtol=2e-2, atol=2e-2), (out, ref)
    print("KERNEL_OK")
</pallas_src>

<mosaic_0001>
module attributes {stable_mosaic.version = 11 : i64} {
  func.func @_fused_forward_kernel(%arg0: memref<8x16xf32, #tpu.memory_space<vmem>>, %arg1: memref<1232x128xf32, #tpu.memory_space<vmem>>, %arg2: memref<16x1xf32, #tpu.memory_space<vmem>>) attributes {dimension_semantics = [], scalar_prefetch = 0 : i64, scratch_operands = 0 : i64, tpu.core_type = #tpu.core_type<tc>} {
    %c0 = arith.constant 0 : index
    %c0_0 = arith.constant 0 : index
    %0 = vector.load %arg0[%c0, %c0_0] : memref<8x16xf32, #tpu.memory_space<vmem>>, vector<8x16xf32>
    %cst = arith.constant 9.99999971E-10 : f32
    %1 = vector.broadcast %cst : f32 to vector<8x16xf32>
    %2 = arith.addf %0, %1 : vector<8x16xf32>
    %3 = math.log %2 : vector<8x16xf32>
    %c0_1 = arith.constant 0 : index
    %c0_2 = arith.constant 0 : index
    %4 = vector.load %arg1[%c0_1, %c0_2] : memref<1232x128xf32, #tpu.memory_space<vmem>>, vector<16x16xf32>
    %cst_3 = arith.constant dense<0.000000e+00> : vector<8x16xf32>
    %5 = tpu.matmul %3, %4, %cst_3 {dimension_numbers = #tpu.dot_dimension_numbers<[1], [0], [0], [1], [0, 0, 1, 1], [], []>} : vector<8x16xf32>, vector<16x16xf32>, vector<8x16xf32> -> vector<8x16xf32>
    %c16 = arith.constant 16 : index
    %c0_4 = arith.constant 0 : index
    %6 = vector.load %arg1[%c16, %c0_4] : memref<1232x128xf32, #tpu.memory_space<vmem>>, vector<16x16xf32>
    %cst_5 = arith.constant dense<0.000000e+00> : vector<8x16xf32>
    %7 = tpu.matmul %3, %6, %cst_5 {dimension_numbers = #tpu.dot_dimension_numbers<[1], [0], [0], [1], [0, 0, 1, 1], [], []>} : vector<8x16xf32>, vector<16x16xf32>, vector<8x16xf32> -> vector<8x16xf32>
    %c32 = arith.constant 32 : index
    %c0_6 = arith.constant 0 : index
    %8 = vector.load %arg1[%c32, %c0_6] : memref<1232x128xf32, #tpu.memory_space<vmem>>, vector<16x16xf32>
    %cst_7 = arith.constant dense<0.000000e+00> : vector<8x16xf32>
    %9 = tpu.matmul %3, %8, %cst_7 {dimension_numbers = #tpu.dot_dimension_numbers<[1], [0], [0], [1], [0, 0, 1, 1], [], []>} : vector<8x16xf32>, vector<16x16xf32>, vector<8x16xf32> -> vector<8x16xf32>
    %c48 = arith.constant 48 : index
    %c0_8 = arith.constant 0 : index
    %10 = vector.load %arg1[%c48, %c0_8] : memref<1232x128xf32, #tpu.memory_space<vmem>>, vector<16x16xf32>
    %cst_9 = arith.constant dense<0.000000e+00> : vector<8x16xf32>
    %11 = tpu.matmul %3, %10, %cst_9 {dimension_numbers = #tpu.dot_dimension_numbers<[1], [0], [0], [1], [0, 0, 1, 1], [], []>} : vector<8x16xf32>, vector<16x16xf32>, vector<8x16xf32> -> vector<8x16xf32>
    %c64 = arith.constant 64 : index
    %c0_10 = arith.constant 0 : index
    %12 = vector.load %arg1[%c64, %c0_10] : memref<1232x128xf32, #tpu.memory_space<vmem>>, vector<16x16xf32>
    %cst_11 = arith.constant dense<0.000000e+00> : vector<8x16xf32>
    %13 = tpu.matmul %3, %12, %cst_11 {dimension_numbers = #tpu.dot_dimension_numbers<[1], [0], [0], [1], [0, 0, 1, 1], [], []>} : vector<8x16xf32>, vector<16x16xf32>, vector<8x16xf32> -> vector<8x16xf32>
    %c80 = arith.constant 80 : index
    %c0_12 = arith.constant 0 : index
    %14 = vector.load %arg1[%c80, %c0_12] : memref<1232x128xf32, #tpu.memory_space<vmem>>, vector<16x16xf32>
    %cst_13 = arith.constant dense<0.000000e+00> : vector<8x16xf32>
    %15 = tpu.matmul %3, %14, %cst_13 {dimension_numbers = #tpu.dot_dimension_numbers<[1], [0], [0], [1], [0, 0, 1, 1], [], []>} : vector<8x16xf32>, vector<16x16xf32>, vector<8x16xf32> -> vector<8x16xf32>
    %16 = tpu.concatenate %5, %7, %9, %11, %13, %15 in 0 : vector<8x16xf32>, vector<8x16xf32>, vector<8x16xf32>, vector<8x16xf32>, vector<8x16xf32>, vector<8x16xf32> -> vector<48x16xf32>
    %c96 = arith.constant 96 : index
    %c0_14 = arith.constant 0 : index
    %17 = vector.load %arg1[%c96, %c0_14] : memref<1232x128xf32, #tpu.memory_space<vmem>>, vector<16x48xf32>
    %cst_15 = arith.constant dense<0.000000e+00> : vector<16x16xf32>
    %18 = tpu.matmul %17, %16, %cst_15 {dimension_numbers = #tpu.dot_dimension_numbers<[1], [0], [0], [1], [0, 0, 1, 1], [], []>} : vector<16x48xf32>, vector<48x16xf32>, vector<16x16xf32> -> vector<16x16xf32>
    %c1168 = arith.constant 1168 : index
    %c0_16 = arith.constant 0 : index
    %19 = vector.load %arg1[%c1168, %c0_16] : memref<1232x128xf32, #tpu.memory_space<vmem>>, vector<16x1xf32>
    %20 = vector.broadcast %19 : vector<16x1xf32> to vector<16x16xf32>
    %21 = arith.addf %18, %20 : vector<16x16xf32>
    %cst_17 = arith.constant 0.000000e+00 : f32
    %22 = vector.broadcast %cst_17 : f32 to vector<16x16xf32>
    %23 = arith.maximumf %21, %22 : vector<16x16xf32>
    %c112 = arith.constant 112 : index
    %c0_18 = arith.constant 0 : index
    %24 = vector.load %arg1[%c112, %c0_18] : memref<1232x128xf32, #tpu.memory_space<vmem>>, vector<64x24xf32>
    %25 = tpu.concatenate %23, %3 in 0 : vector<16x16xf32>, vector<8x16xf32> -> vector<24x16xf32>
    %cst_19 = arith.constant dense<0.000000e+00> : vector<64x16xf32>
    %26 = tpu.matmul %24, %25, %cst_19 {dimension_numbers = #tpu.dot_dimension_numbers<[1], [0], [0], [1], [0, 0, 1, 1], [], []>} : vector<64x24xf32>, vector<24x16xf32>, vector<64x16xf32> -> vector<64x16xf32>
    %c1168_20 = arith.constant 1168 : index
    %c1 = arith.constant 1 : index
    %27 = vector.load %arg1[%c1168_20, %c1] : memref<1232x128xf32, #tpu.memory_space<vmem>>, vector<64x1xf32>
    %28 = vector.broadcast %27 : vector<64x1xf32> to vector<64x16xf32>
    %29 = arith.addf %26, %28 : vector<64x16xf32>
    %cst_21 = arith.constant 0.000000e+00 : f32
    %30 = vector.broadcast %cst_21 : f32 to vector<64x16xf32>
    %31 = arith.maximumf %29, %30 : vector<64x16xf32>
    %c176 = arith.constant 176 : index
    %c0_22 = arith.constant 0 : index
    %32 = vector.load %arg1[%c176, %c0_22] : memref<1232x128xf32, #tpu.memory_space<vmem>>, vector<16x16xf32>
    %cst_23 = arith.constant dense<0.000000e+00> : vector<64x16xf32>
    %33 = tpu.matmul %31, %32, %cst_23 {dimension_numbers = #tpu.dot_dimension_numbers<[1], [0], [0], [1], [0, 0, 1, 1], [], []>} : vector<64x16xf32>, vector<16x16xf32>, vector<64x16xf32> -> vector<64x16xf32>
    %c192 = arith.constant 192 : index
    %c0_24 = arith.constant 0 : index
    %34 = vector.load %arg1[%c192, %c0_24] : memref<1232x128xf32, #tpu.memory_space<vmem>>, vector<16x16xf32>
    %cst_25 = arith.constant dense<0.000000e+00> : vector<64x16xf32>
    %35 = tpu.matmul %31, %34, %cst_25 {dimension_numbers = #tpu.dot_dimension_numbers<[1], [0], [0], [1], [0, 0, 1, 1], [], []>} : vector<64x16xf32>, vector<16x16xf32>, vector<64x16xf32> -> vector<64x16xf32>
    %c208 = arith.constant 208 : index
    %c0_26 = arith.constant 0 : index
    %36 = vector.load %arg1[%c208, %c0_26] : memref<1232x128xf32, #tpu.memory_space<vmem>>, vector<16x16xf32>
    %cst_27 = arith.constant dense<0.000000e+00> : vector<64x16xf32>
    %37 = tpu.matmul %31, %36, %cst_27 {dimension_numbers = #tpu.dot_dimension_numbers<[1], [0], [0], [1], [0, 0, 1, 1], [], []>} : vector<64x16xf32>, vector<16x16xf32>, vector<64x16xf32> -> vector<64x16xf32>
    %c272 = arith.constant 272 : index
    %c0_28 = arith.constant 0 : index
    %38 = vector.load %arg1[%c272, %c0_28] : memref<1232x128xf32, #tpu.memory_space<vmem>>, vector<64x128xf32>
    %39 = tpu.concatenate %33, %35 in 0 : vector<64x16xf32>, vector<64x16xf32> -> vector<128x16xf32>
    %cst_29 = arith.constant dense<0.000000e+00> : vector<64x16xf32>
    %40 = tpu.matmul %38, %39, %cst_29 {dimension_numbers = #tpu.dot_dimension_numbers<[1], [0], [0], [1], [0, 0, 1, 1], [], []>} : vector<64x128xf32>, vector<128x16xf32>, vector<64x16xf32> -> vector<64x16xf32>
    %c336 = arith.constant 336 : index
    %c0_30 = arith.constant 0 : index
    %41 = vector.load %arg1[%c336, %c0_30] : memref<1232x128xf32, #tpu.memory_space<vmem>>, vector<64x64xf32>
    %cst_31 = arith.constant dense<0.000000e+00> : vector<64x16xf32>
    %42 = tpu.matmul %41, %37, %cst_31 {dimension_numbers = #tpu.dot_dimension_numbers<[1], [0], [0], [1], [0, 0, 1, 1], [], []>} : vector<64x64xf32>, vector<64x16xf32>, vector<64x16xf32> -> vector<64x16xf32>
    %43 = arith.addf %40, %42 : vector<64x16xf32>
    %c1168_32 = arith.constant 1168 : index
    %c2 = arith.constant 2 : index
    %44 = vector.load %arg1[%c1168_32, %c2] : memref<1232x128xf32, #tpu.memory_space<vmem>>, vector<64x1xf32>
    %45 = vector.broadcast %44 : vector<64x1xf32> to vector<64x16xf32>
    %46 = arith.addf %43, %45 : vector<64x16xf32>
    %cst_33 = arith.constant 0.000000e+00 : f32
    %47 = vector.broadcast %cst_33 : f32 to vector<64x16xf32>
    %48 = arith.maximumf %46, %47 : vector<64x16xf32>
    %c224 = arith.constant 224 : index
    %c0_34 = arith.constant 0 : index
    %49 = vector.load %arg1[%c224, %c0_34] : memref<1232x128xf32, #tpu.memory_space<vmem>>, vector<16x16xf32>
    %cst_35 = arith.constant dense<0.000000e+00> : vector<64x16xf32>
    %50 = tpu.matmul %48, %49, %cst_35 {dimension_numbers = #tpu.dot_dimension_numbers<[1], [0], [0], [1], [0, 0, 1, 1], [], []>} : vector<64x16xf32>, vector<16x16xf32>, vector<64x16xf32> -> vector<64x16xf32>
    %c240 = arith.constant 240 : index
    %c0_36 = arith.constant 0 : index
    %51 = vector.load %arg1[%c240, %c0_36] : memref<1232x128xf32, #tpu.memory_space<vmem>>, vector<16x16xf32>
    %cst_37 = arith.constant dense<0.000000e+00> : vector<64x16xf32>
    %52 = tpu.matmul %48, %51, %cst_37 {dimension_numbers = #tpu.dot_dimension_numbers<[1], [0], [0], [1], [0, 0, 1, 1], [], []>} : vector<64x16xf32>, vector<16x16xf32>, vector<64x16xf32> -> vector<64x16xf32>
    %c256 = arith.constant 256 : index
    %c0_38 = arith.constant 0 : index
    %53 = vector.load %arg1[%c256, %c0_38] : memref<1232x128xf32, #tpu.memory_space<vmem>>, vector<16x16xf32>
    %cst_39 = arith.constant dense<0.000000e+00> : vector<64x16xf32>
    %54 = tpu.matmul %48, %53, %cst_39 {dimension_numbers = #tpu.dot_dimension_numbers<[1], [0], [0], [1], [0, 0, 1, 1], [], []>} : vector<64x16xf32>, vector<16x16xf32>, vector<64x16xf32> -> vector<64x16xf32>
    %c400 = arith.constant 400 : index
    %c0_40 = arith.constant 0 : index
    %55 = vector.load %arg1[%c400, %c0_40] : memref<1232x128xf32, #tpu.memory_space<vmem>>, vector<64x128xf32>
    %56 = tpu.concatenate %50, %52 in 0 : vector<64x16xf32>, vector<64x16xf32> -> vector<128x16xf32>
    %cst_41 = arith.constant dense<0.000000e+00> : vector<64x16xf32>
    %57 = tpu.matmul %55, %56, %cst_41 {dimension_numbers = #tpu.dot_dimension_numbers<[1], [0], [0], [1], [0, 0, 1, 1], [], []>} : vector<64x128xf32>, vector<128x16xf32>, vector<64x16xf32> -> vector<64x16xf32>
    %c464 = arith.constant 464 : index
    %c0_42 = arith.constant 0 : index
    %58 = vector.load %arg1[%c464, %c0_42] : memref<1232x128xf32, #tpu.memory_space<vmem>>, vector<64x64xf32>
    %cst_43 = arith.constant dense<0.000000e+00> : vector<64x16xf32>
    %59 = tpu.matmul %58, %54, %cst_43 {dimension_numbers = #tpu.dot_dimension_numbers<[1], [0], [0], [1], [0, 0, 1, 1], [], []>} : vector<64x64xf32>, vector<64x16xf32>, vector<64x16xf32> -> vector<64x16xf32>
    %60 = arith.addf %57, %59 : vector<64x16xf32>
    %c1168_44 = arith.constant 1168 : index
    %c3 = arith.constant 3 : index
    %61 = vector.load %arg1[%c1168_44, %c3] : memref<1232x128xf32, #tpu.memory_space<vmem>>, vector<64x1xf32>
    %62 = vector.broadcast %61 : vector<64x1xf32> to vector<64x16xf32>
    %63 = arith.addf %60, %62 : vector<64x16xf32>
    %cst_45 = arith.constant 0.000000e+00 : f32
    %64 = vector.broadcast %cst_45 : f32 to vector<64x16xf32>
    %65 = arith.maximumf %63, %64 : vector<64x16xf32>
    %66 = arith.addf %31, %65 : vector<64x16xf32>
    %c528 = arith.constant 528 : index
    %c0_46 = arith.constant 0 : index
    %67 = vector.load %arg1[%c528, %c0_46] : memref<1232x128xf32, #tpu.memory_space<vmem>>, vector<16x16xf32>
    %cst_47 = arith.constant dense<0.000000e+00> : vector<64x16xf32>
    %68 = tpu.matmul %66, %67, %cst_47 {dimension_numbers = #tpu.dot_dimension_numbers<[1], [0], [0], [1], [0, 0, 1, 1], [], []>} : vector<64x16xf32>, vector<16x16xf32>, vector<64x16xf32> -> vector<64x16xf32>
    %c544 = arith.constant 544 : index
    %c0_48 = arith.constant 0 : index
    %69 = vector.load %arg1[%c544, %c0_48] : memref<1232x128xf32, #tpu.memory_space<vmem>>, vector<16x16xf32>
    %cst_49 = arith.constant dense<0.000000e+00> : vector<64x16xf32>
    %70 = tpu.matmul %66, %69, %cst_49 {dimension_numbers = #tpu.dot_dimension_numbers<[1], [0], [0], [1], [0, 0, 1, 1], [], []>} : vector<64x16xf32>, vector<16x16xf32>, vector<64x16xf32> -> vector<64x16xf32>
    %c560 = arith.constant 560 : index
    %c0_50 = arith.constant 0 : index
    %71 = vector.load %arg1[%c560, %c0_50] : memref<1232x128xf32, #tpu.memory_space<vmem>>, vector<16x16xf32>
    %cst_51 = arith.constant dense<0.000000e+00> : vector<64x16xf32>
    %72 = tpu.matmul %66, %71, %cst_51 {dimension_numbers = #tpu.dot_dimension_numbers<[1], [0], [0], [1], [0, 0, 1, 1], [], []>} : vector<64x16xf32>, vector<16x16xf32>, vector<64x16xf32> -> vector<64x16xf32>
    %c624 = arith.constant 624 : index
    %c0_52 = arith.constant 0 : index
    %73 = vector.load %arg1[%c624, %c0_52] : memref<1232x128xf32, #tpu.memory_space<vmem>>, vector<64x128xf32>
    %74 = tpu.concatenate %68, %70 in 0 : vector<64x16xf32>, vector<64x16xf32> -> vector<128x16xf32>
    %cst_53 = arith.constant dense<0.000000e+00> : vector<64x16xf32>
    %75 = tpu.matmul %73, %74, %cst_53 {dimension_numbers = #tpu.dot_dimension_numbers<[1], [0], [0], [1], [0, 0, 1, 1], [], []>} : vector<64x128xf32>, vector<128x16xf32>, vector<64x16xf32> -> vector<64x16xf32>
    %c688 = arith.constant 688 : index
    %c0_54 = arith.constant 0 : index
    %76 = vector.load %arg1[%c688, %c0_54] : memref<1232x128xf32, #tpu.memory_space<vmem>>, vector<64x64xf32>
    %cst_55 = arith.constant dense<0.000000e+00> : vector<64x16xf32>
    %77 = tpu.matmul %76, %72, %cst_55 {dimension_numbers = #tpu.dot_dimension_numbers<[1], [0], [0], [1], [0, 0, 1, 1], [], []>} : vector<64x64xf32>, vector<64x16xf32>, vector<64x16xf32> -> vector<64x16xf32>
    %78 = arith.addf %75, %77 : vector<64x16xf32>
    %c1168_56 = arith.constant 1168 : index
    %c4 = arith.constant 4 : index
    %79 = vector.load %arg1[%c1168_56, %c4] : memref<1232x128xf32, #tpu.memory_space<vmem>>, vector<64x1xf32>
    %80 = vector.broadcast %79 : vector<64x1xf32> to vector<64x16xf32>
    %81 = arith.addf %78, %80 : vector<64x16xf32>
    %cst_57 = arith.constant 0.000000e+00 : f32
    %82 = vector.broadcast %cst_57 : f32 to vector<64x16xf32>
    %83 = arith.maximumf %81, %82 : vector<64x16xf32>
    %c576 = arith.constant 576 : index
    %c0_58 = arith.constant 0 : index
    %84 = vector.load %arg1[%c576, %c0_58] : memref<1232x128xf32, #tpu.memory_space<vmem>>, vector<16x8xf32>
    %cst_59 = arith.constant dense<0.000000e+00> : vector<64x8xf32>
    %85 = tpu.matmul %83, %84, %cst_59 {dimension_numbers = #tpu.dot_dimension_numbers<[1], [0], [0], [1], [0, 0, 1, 1], [], []>} : vector<64x16xf32>, vector<16x8xf32>, vector<64x8xf32> -> vector<64x8xf32>
    %c592 = arith.constant 592 : index
    %c0_60 = arith.constant 0 : index
    %86 = vector.load %arg1[%c592, %c0_60] : memref<1232x128xf32, #tpu.memory_space<vmem>>, vector<16x8xf32>
    %cst_61 = arith.constant dense<0.000000e+00> : vector<64x8xf32>
    %87 = tpu.matmul %83, %86, %cst_61 {dimension_numbers = #tpu.dot_dimension_numbers<[1], [0], [0], [1], [0, 0, 1, 1], [], []>} : vector<64x16xf32>, vector<16x8xf32>, vector<64x8xf32> -> vector<64x8xf32>
    %c608 = arith.constant 608 : index
    %c0_62 = arith.constant 0 : index
    %88 = vector.load %arg1[%c608, %c0_62] : memref<1232x128xf32, #tpu.memory_space<vmem>>, vector<16x8xf32>
    %cst_63 = arith.constant dense<0.000000e+00> : vector<64x8xf32>
    %89 = tpu.matmul %83, %88, %cst_63 {dimension_numbers = #tpu.dot_dimension_numbers<[1], [0], [0], [1], [0, 0, 1, 1], [], []>} : vector<64x16xf32>, vector<16x8xf32>, vector<64x8xf32> -> vector<64x8xf32>
    %c752 = arith.constant 752 : index
    %c0_64 = arith.constant 0 : index
    %90 = vector.load %arg1[%c752, %c0_64] : memref<1232x128xf32, #tpu.memory_space<vmem>>, vector<64x128xf32>
    %91 = tpu.concatenate %85, %87 in 0 : vector<64x8xf32>, vector<64x8xf32> -> vector<128x8xf32>
    %cst_65 = arith.constant dense<0.000000e+00> : vector<64x8xf32>
    %92 = tpu.matmul %90, %91, %cst_65 {dimension_numbers = #tpu.dot_dimension_numbers<[1], [0], [0], [1], [0, 0, 1, 1], [], []>} : vector<64x128xf32>, vector<128x8xf32>, vector<64x8xf32> -> vector<64x8xf32>
    %c816 = arith.constant 816 : index
    %c0_66 = arith.constant 0 : index
    %93 = vector.load %arg1[%c816, %c0_66] : memref<1232x128xf32, #tpu.memory_space<vmem>>, vector<64x64xf32>
    %cst_67 = arith.constant dense<0.000000e+00> : vector<64x8xf32>
    %94 = tpu.matmul %93, %89, %cst_67 {dimension_numbers = #tpu.dot_dimension_numbers<[1], [0], [0], [1], [0, 0, 1, 1], [], []>} : vector<64x64xf32>, vector<64x8xf32>, vector<64x8xf32> -> vector<64x8xf32>
    %95 = arith.addf %92, %94 : vector<64x8xf32>
    %c1168_68 = arith.constant 1168 : index
    %c5 = arith.constant 5 : index
    %96 = vector.load %arg1[%c1168_68, %c5] : memref<1232x128xf32, #tpu.memory_space<vmem>>, vector<64x1xf32>
    %97 = vector.broadcast %96 : vector<64x1xf32> to vector<64x8xf32>
    %98 = arith.addf %95, %97 : vector<64x8xf32>
    %cst_69 = arith.constant 0.000000e+00 : f32
    %99 = vector.broadcast %cst_69 : f32 to vector<64x8xf32>
    %100 = arith.maximumf %98, %99 : vector<64x8xf32>
    %c880 = arith.constant 880 : index
    %c0_70 = arith.constant 0 : index
    %101 = vector.load %arg1[%c880, %c0_70] : memref<1232x128xf32, #tpu.memory_space<vmem>>, vector<16x8xf32>
    %cst_71 = arith.constant dense<0.000000e+00> : vector<64x8xf32>
    %102 = tpu.matmul %66, %101, %cst_71 {dimension_numbers = #tpu.dot_dimension_numbers<[1], [0], [0], [1], [0, 0, 1, 1], [], []>} : vector<64x16xf32>, vector<16x8xf32>, vector<64x8xf32> -> vector<64x8xf32>
    %103 = arith.addf %102, %100 : vector<64x8xf32>
    %c1168_72 = arith.constant 1168 : index
    %c11 = arith.constant 11 : index
    %104 = vector.load %arg1[%c1168_72, %c11] : memref<1232x128xf32, #tpu.memory_space<vmem>>, vector<8x1xf32>
    %cst_73 = arith.constant dense<0.000000e+00> : vector<64x1xf32>
    %105 = tpu.matmul %103, %104, %cst_73 {dimension_numbers = #tpu.dot_dimension_numbers<[1], [0], [0], [1], [0, 0, 1, 1], [], []>} : vector<64x8xf32>, vector<8x1xf32>, vector<64x1xf32> -> vector<64x1xf32>
    %c896 = arith.constant 896 : index
    %c0_74 = arith.constant 0 : index
    %106 = vector.load %arg1[%c896, %c0_74] : memref<1232x128xf32, #tpu.memory_space<vmem>>, vector<64x64xf32>
    %cst_75 = arith.constant dense<0.000000e+00> : vector<64x1xf32>
    %107 = tpu.matmul %106, %105, %cst_75 {dimension_numbers = #tpu.dot_dimension_numbers<[1], [0], [0], [1], [0, 0, 1, 1], [], []>} : vector<64x64xf32>, vector<64x1xf32>, vector<64x1xf32> -> vector<64x1xf32>
    %c1168_76 = arith.constant 1168 : index
    %c6 = arith.constant 6 : index
    %108 = vector.load %arg1[%c1168_76, %c6] : memref<1232x128xf32, #tpu.memory_space<vmem>>, vector<64x1xf32>
    %109 = arith.addf %107, %108 : vector<64x1xf32>
    %cst_77 = arith.constant 0.000000e+00 : f32
    %110 = vector.broadcast %cst_77 : f32 to vector<64x1xf32>
    %111 = arith.maximumf %109, %110 : vector<64x1xf32>
    %c960 = arith.constant 960 : index
    %c0_78 = arith.constant 0 : index
    %112 = vector.load %arg1[%c960, %c0_78] : memref<1232x128xf32, #tpu.memory_space<vmem>>, vector<64x64xf32>
    %cst_79 = arith.constant dense<0.000000e+00> : vector<64x1xf32>
    %113 = tpu.matmul %112, %111, %cst_79 {dimension_numbers = #tpu.dot_dimension_numbers<[1], [0], [0], [1], [0, 0, 1, 1], [], []>} : vector<64x64xf32>, vector<64x1xf32>, vector<64x1xf32> -> vector<64x1xf32>
    %c1168_80 = arith.constant 1168 : index
    %c7 = arith.constant 7 : index
    %114 = vector.load %arg1[%c1168_80, %c7] : memref<1232x128xf32, #tpu.memory_space<vmem>>, vector<64x1xf32>
    %115 = arith.addf %113, %114 : vector<64x1xf32>
    %cst_81 = arith.constant 0.000000e+00 : f32
    %116 = vector.broadcast %cst_81 : f32 to vector<64x1xf32>
    %117 = arith.maximumf %115, %116 : vector<64x1xf32>
    %118 = arith.addf %105, %117 : vector<64x1xf32>
    %c1024 = arith.constant 1024 : index
    %c0_82 = arith.constant 0 : index
    %119 = vector.load %arg1[%c1024, %c0_82] : memref<1232x128xf32, #tpu.memory_space<vmem>>, vector<64x64xf32>
    %cst_83 = arith.constant dense<0.000000e+00> : vector<64x1xf32>
    %120 = tpu.matmul %119, %118, %cst_83 {dimension_numbers = #tpu.dot_dimension_numbers<[1], [0], [0], [1], [0, 0, 1, 1], [], []>} : vector<64x64xf32>, vector<64x1xf32>, vector<64x1xf32> -> vector<64x1xf32>
    %c1168_84 = arith.constant 1168 : index
    %c8 = arith.constant 8 : index
    %121 = vector.load %arg1[%c1168_84, %c8] : memref<1232x128xf32, #tpu.memory_space<vmem>>, vector<64x1xf32>
    %122 = arith.addf %120, %121 : vector<64x1xf32>
    %cst_85 = arith.constant 0.000000e+00 : f32
    %123 = vector.broadcast %cst_85 : f32 to vector<64x1xf32>
    %124 = arith.maximumf %122, %123 : vector<64x1xf32>
    %c1088 = arith.constant 1088 : index
    %c0_86 = arith.constant 0 : index
    %125 = vector.load %arg1[%c1088, %c0_86] : memref<1232x128xf32, #tpu.memory_space<vmem>>, vector<64x64xf32>
    %cst_87 = arith.constant dense<0.000000e+00> : vector<64x1xf32>
    %126 = tpu.matmul %125, %124, %cst_87 {dimension_numbers = #tpu.dot_dimension_numbers<[1], [0], [0], [1], [0, 0, 1, 1], [], []>} : vector<64x64xf32>, vector<64x1xf32>, vector<64x1xf32> -> vector<64x1xf32>
    %c1168_88 = arith.constant 1168 : index
    %c9 = arith.constant 9 : index
    %127 = vector.load %arg1[%c1168_88, %c9] : memref<1232x128xf32, #tpu.memory_space<vmem>>, vector<64x1xf32>
    %128 = arith.addf %126, %127 : vector<64x1xf32>
    %cst_89 = arith.constant 0.000000e+00 : f32
    %129 = vector.broadcast %cst_89 : f32 to vector<64x1xf32>
    %130 = arith.maximumf %128, %129 : vector<64x1xf32>
    %131 = arith.addf %118, %130 : vector<64x1xf32>
    %c1152 = arith.constant 1152 : index
    %c0_90 = arith.constant 0 : index
    %132 = vector.load %arg1[%c1152, %c0_90] : memref<1232x128xf32, #tpu.memory_space<vmem>>, vector<16x64xf32>
    %cst_91 = arith.constant dense<0.000000e+00> : vector<16x1xf32>
    %133 = tpu.matmul %132, %131, %cst_91 {dimension_numbers = #tpu.dot_dimension_numbers<[1], [0], [0], [1], [0, 0, 1, 1], [], []>} : vector<16x64xf32>, vector<64x1xf32>, vector<16x1xf32> -> vector<16x1xf32>
    %c1168_92 = arith.constant 1168 : index
    %c10 = arith.constant 10 : index
    %134 = vector.load %arg1[%c1168_92, %c10] : memref<1232x128xf32, #tpu.memory_space<vmem>>, vector<16x1xf32>
    %135 = arith.addf %133, %134 : vector<16x1xf32>
    %c0_93 = arith.constant 0 : index
    %c0_94 = arith.constant 0 : index
    %136 = vector.load %arg2[%c0_93, %c0_94] : memref<16x1xf32, #tpu.memory_space<vmem>>, vector<16x1xf32>
    tpu.vector_store %arg2[%c0_93, %c0_94], %135 {strides = array<i32>} : memref<16x1xf32, #tpu.memory_space<vmem>>, vector<16x1xf32>,
    return
  }
}

</mosaic_0001>

<bundles_post_ra>
// kernel: speaker_encoder_forward.1
= control target key start
LH: loop header
LB: loop body
LE: loop exit
PB: predicated region body
PF: predicated region fallthrough
CT: control target
= control target key end

     0   :  { %7 = vsyncpa [#allocation3], 0  ;;  %s3051_s0 = inlined_call_operand.hbm [shape: f32[8,16], index: 0, kind: input, shape index: {}]   ;;  %s3052_s1 = inlined_call_operand.hbm [shape: f32[1232,128], index: 1, kind: input, shape index: {}]   ;;  %s3053_s2 = inlined_call_operand.vmem [shape: f32[16,1], index: 2, kind: output, shape index: {}]  }
   0x1   :  { %s14_s11 = sshll.u32 %s3051_s0, 4  ;;  %s15_s11 = int_to_ptr.hbm [resolvable:$true] %s14_s11 }
   0x2   :  { %8 = vsyncpa [#allocation5], 0  ;;  %s2544_s12 = smov [#allocation2]   ;;  %s24_s16 = sshll.u32 %s3052_s1, 4  ;;  %s25_s16 = int_to_ptr.hbm [resolvable:$true] %s24_s16 }
   0x3   :  { %s16_s13 = sshll.u32 %s2544_s12, 4  ;;  %s2545_s17 = smov [#allocation4]   ;;  %s17_s13 = int_to_ptr.vmem [resolvable:$true] %s16_s13 }
   0x4   :  { %19 = dma.hbm_to_vmem [thread:$0]  %s15_s11, 128, %s17_s13, [#allocation3]  }
   0x5   :  { %s26_s18 = sshll.u32 %s2545_s17, 4  ;;  %s2546_s19 = smov 128   ;;  %s27_s18 = int_to_ptr.vmem [resolvable:$true] %s26_s18 }
   0x6   :  { %s2547_s20 = smov 8  }
   0x7   :  { %32 = dma.hbm_to_vmem [thread:$0]  %s25_s16, 19712, %s27_s18, [#allocation5], %s2546_s19, %s2546_s19, %s2547_s20  }
   0x8   :  { %2540 = dma.done.wait [#allocation3], 128  }
   0x9   :  { %2541 = vsyncadd [#allocation3], 4294967168 }
   0xa   :  { %2542 = dma.done.wait [#allocation5], 19712  }
   0xb   :  { %2543 = vsyncadd [#allocation5], 4294947584  ;;  %v46_v0 = vld [vmem:[#allocation4 + $0x8] sm:$0xff]  ;;  %v45_v1 = vld [vmem:[#allocation4] sm:$0xff]  ;;  %vm47_vm0 = vcmask 130048   ;;  %v2548_v18 = vmov 0  }
   0xc   :  { %v41_v2 = vld [vmem:[#allocation2] sm:$0xff]  ;;  %65 = vmatpush.msra.mxu2 %v46_v0  ;;  %v71_v6 = vld [vmem:[#allocation4 + $0x10] sm:$0xff]  ;;  %v94_v12 = vld [vmem:[#allocation4 + $0x28] sm:$0xff]  ;;  %2464 = vset.pattern.permute.xlu0 %v2548_v18  ;;  %vm195_vm1 = vcmask 392192   ;;  %v2549_v27 = vmov 1   ;;  %vm283_vm2 = vcmask 195584  }
   0xd   :  { %v42_v3 = vadd.f32 1e-09, %v41_v2  ;;  %v72_v4 = vld [vmem:[#allocation4 + $0x18] sm:$0xff]  ;;  %v115_v7 = vld [vmem:[#allocation4 + $0x30] sm:$0xff]  ;;  %v93_v13 = vld [vmem:[#allocation4 + $0x20] sm:$0xff]  ;;  %2465 = vset.pattern.permute.xlu1 %v2549_v27  ;;  %2466 = vset.pattern.permute.xlu2 %v2549_v27  ;;  %vm526_vm3 = vcmask 523264  }
   0xe   :  { %v116_v5 = vld [vmem:[#allocation4 + $0x38] sm:$0xff]  ;;  %66 = vmatpush.msra.mxu2 %v45_v1  ;;  %v159_v9 = vld [vmem:[#allocation4 + $0x50] sm:$0xff]  ;;  %v138_v14 = vld [vmem:[#allocation4 + $0x48] sm:$0xff]  ;;  %s2554_s0 = smov 117   ;;  %vm1706_vm4 = vcmask 64512   ;;  %s2555_s1 = smov 122  }
   0xf   :  { %2480 = vlog2.f32 %v42_v3  ;;  %131 = vmatpush.msra.mxu3 %v116_v5  ;;  %v160_v8 = vld [vmem:[#allocation4 + $0x58] sm:$0xff]  ;;  %v137_v15 = vld [vmem:[#allocation4 + $0x40] sm:$0xff]  ;;  %v2590_v22 = vld [vmem:[#allocation4 + $0x490] sm:$0xff]  ;;  %s2556_s21 = smov 121   ;;  %s2557_s22 = smov 120   ;;  %vm2245_vm5 = vcmask 7168  }
  0x10   :  { %87 = vmatpush.msrb.mxu2 %v72_v4  ;;  %175 = vmatpush.msra.mxu1 %v160_v8  ;;  %v2587_v20 = vld [vmem:[#allocation4 + $0x498] sm:$0xff]  ;;  %v181_v25 = vld [vmem:[#allocation4 + $0x60] sm:$0xff]  ;;  %v182_v26 = vld [vmem:[#allocation4 + $0x68] sm:$0xff]  ;;  %s2558_s23 = smov 119   ;;  %s2559_s24 = smov 118  }
  0x11   :  { %132 = vmatpush.msra.mxu3 %v115_v7  ;;  %192 = vperm.xlu0 %2464, %v2587_v20   ;;  %v2595_v28 = vld [vmem:[#allocation4 + $0x4b8] sm:$0xff]  ;;  %v2598_v31 = vld [vmem:[#allocation4 + $0x4c8] sm:$0xff]  ;;  %v227_v38 = vld [vmem:[#allocation4 + $0x70] sm:$0xff] }
  0x12   :  { %88 = vmatpush.msrb.mxu2 %v71_v6  ;;  %176 = vmatpush.msra.mxu1 %v159_v9  ;;  %v228_v39 = vld [vmem:[#allocation4 + $0x78] sm:$0xff]  ;;  %v2603_v40 = vld [vmem:[#allocation4 + $0x4a0] sm:$0xff]  ;;  %v2607_v42 = vld [vmem:[#allocation4 + $0x4a8] sm:$0xff] }
  0x13   :  { %245 = vperm.xlu1 %2465, %v2590_v22   ;;  %255 = vperm.xlu2 %2466, %v2603_v40   ;;  %v229_v41 = vld [vmem:[#allocation4 + $0x80] sm:$0xff]  ;;  %v2609_v43 = vld [vmem:[#allocation4 + $0x4b0] sm:$0xff]  ;;  %v230_v44 = vld [vmem:[#allocation4 + $0x88] sm:$0xff] }
  0x14   :  { %v2614_v45 = vld [vmem:[#allocation4 + $0x4c0] sm:$0xff]  ;;  %v231_v46 = vld [vmem:[#allocation4 + $0x90] sm:$0xff]  ;;  %v232_v47 = vld [vmem:[#allocation4 + $0x98] sm:$0xff] }
  0x15   :  { %v2481_v10 = vpop.eup %2480  ;;  %v233_v48 = vld [vmem:[#allocation4 + $0xa0] sm:$0xff]  ;;  %v234_v49 = vld [vmem:[#allocation4 + $0xa8] sm:$0xff]  ;;  %v358_v50 = vld [vmem:[#allocation4 + $0xb8] sm:$0xff] }
  0x16   :  { %v44_v11 = vmul.f32 0.6931472, %v2481_v10  ;;  %v425_v51 = vld [vmem:[#allocation4 + $0xc8] sm:$0xff]  ;;  %v468_v52 = vld [vmem:[#allocation4 + $0xd8] sm:$0xff]  ;;  %397 = vmatpush.msra.mxu0 %v358_v50  ;;  %v357_v53 = vld [vmem:[#allocation4 + $0xb0] sm:$0xff] }
  0x17   :  { %440 = vmatpush.msrb.mxu1 %v425_v51  ;;  %v424_v54 = vld [vmem:[#allocation4 + $0xc0] sm:$0xff]  ;;  %v467_v55 = vld [vmem:[#allocation4 + $0xd0] sm:$0xff] }
  0x18   :  { %2254 = vmatmul.msk.f32.vlgmr.msra.gmra.mxu2 %vm47_vm0, %v44_v11  ;;  %2257 = vmatmul.msk.f32.vlgmr.msra.gmra.mxu3 %vm47_vm0, %v44_v11 }
  0x19   :  { %109 = vmatpush.msra.mxu2 %v94_v12  ;;  %2259 = vmatmul.msk.f32.vlgmr.msra.gmra.mxu1 %vm47_vm0, %v44_v11 }
  0x1a   :  { %321 = vmatpush.msrb.mxu3 %v44_v11  ;;  %187 = vperm.xlu0 %2464, %v2590_v22  }
  0x1b   :  { %110 = vmatpush.msra.mxu2 %v93_v13  ;;  %250 = vperm.xlu1 %2465, %v2587_v20  }
  0x1c   :  { %260 = vperm.xlu2 %2466, %v2607_v42   ;;  %398 = vmatpush.msra.mxu0 %v357_v53 }
  0x1d   :  { %441 = vmatpush.msrb.mxu1 %v424_v54 }
  0x20   :  { %2255 = vmatmul.msk.f32.vlgmr.msrb.gmra.mxu2 %vm47_vm0, %v44_v11 }
  0x21   :  { %153 = vmatpush.msrb.mxu2 %v138_v14 }
  0x22   :  { %2467 = vset.pattern.permute.xlu0 %v2549_v27 }
  0x23   :  { %154 = vmatpush.msrb.mxu2 %v137_v15  ;;  %270 = vperm.xlu1 %2465, %v2595_v28  }
  0x24   :  { %265 = vperm.xlu0 %2467, %v2609_v43   ;;  %275 = vperm.xlu2 %2466, %v2614_v45  }
  0x28   :  { %2256 = vmatmul.msk.f32.vlgmr.msra.gmra.mxu2 %vm47_vm0, %v44_v11 }
  0x2b   :  { %280 = vperm.xlu1 %2465, %v2598_v31  }
  0x30   :  { %2258 = vmatmul.msk.f32.vlgmr.msrb.gmra.mxu2 %vm47_vm0, %v44_v11 }
  0x6d   :  { %v256_v0 = vpop.permute.xlu2 %255 }
  0x76   :  { %v261_v4 = vpop.permute.xlu2 %260 }
  0x83   :  { %v193_v29 = vpop.permute.xlu0 %192 }
  0x85   :  { %v246_v56 = vpop.permute.xlu1 %245 }
  0x8c   :  { %v188_v32 = vpop.permute.xlu0 %187 }
  0x8d   :  { %v251_v60 = vpop.permute.xlu1 %250 }
  0x95   :  { %v271_v12 = vpop.permute.xlu1 %270 }
  0x96   :  { %v178_v16 = vpop.f32.mrf.mxu1  ;;  %v266_v8 = vpop.permute.xlu0 %265 }
  0x97   :  { %212 = vmatpush.msra.mxu2 %v178_v16  ;;  %v276_v16 = vpop.permute.xlu2 %275 }
  0x9b   :  { %v68_v17 = vpop.f32.mrf.mxu2  ;;  %v134_v24 = vpop.f32.mrf.mxu3 }
  0xa3   :  { %v90_v19 = vpop.f32.mrf.mxu2 }
  0xab   :  { %v112_v21 = vpop.f32.mrf.mxu2 }
  0xb3   :  { %v156_v23 = vpop.f32.mrf.mxu2 }
  0xb4   :  { %213 = vmatpush.msra.mxu2 %v156_v23 }
  0xb6   :  { %214 = vmatpush.msra.mxu2 %v134_v24 }
  0xb8   :  { %215 = vmatpush.msra.mxu2 %v112_v21  ;;  %v281_v21 = vpop.permute.xlu1 %280 }
  0xba   :  { %216 = vmatpush.msra.mxu2 %v90_v19 }
  0xbc   :  { %217 = vmatpush.msra.mxu2 %v68_v17 }
  0xbd   :  { %2260 = vmatmul.msk.f32.vlgmr.msra.gmra.mxu2 %vm195_vm1, %v181_v25 }
  0xbe   :  { %483 = vmatpush.msrb.mxu2 %v468_v52 }
  0xc0   :  { %484 = vmatpush.msrb.mxu2 %v467_v55  ;;  %v2550_v55 = vmov 2  }
  0xc1   :  { %2470 = vset.pattern.permute.xlu1 %v2550_v55  ;;  %2469 = vset.pattern.permute.xlu0 %v2550_v55 }
  0xc2   :  { %642 = vperm.xlu1 %2470, %v2603_v40   ;;  %638 = vperm.xlu0 %2469, %v2587_v20  }
  0xc3   :  { %2468 = vset.pattern.permute.xlu2 %v2550_v55 }
  0xc4   :  { %634 = vperm.xlu2 %2468, %v2590_v22  }
  0xc5   :  { %2261 = vmatmul.msk.f32.gmra.mxu2 %vm195_vm1, %v182_v26 }
  0xca   :  { %650 = vperm.xlu1 %2470, %v2609_v43   ;;  %658 = vperm.xlu0 %2469, %v2614_v45  }
  0xcc   :  { %646 = vperm.xlu2 %2468, %v2607_v42  }
  0xd2   :  { %662 = vperm.xlu1 %2470, %v2598_v31  }
  0xd4   :  { %654 = vperm.xlu2 %2468, %v2595_v28  }
 0x140   :  { %v219_v30 = vpop.f32.mrf.mxu2 }
 0x141   :  { %v220_v34 = vadd.f32 %v219_v30, %v188_v32 }
 0x143   :  { %v225_v37 = vmax.f32 %v220_v34, 0.0 }
 0x148   :  { %v222_v33 = vpop.f32.mrf.mxu2 }
 0x149   :  { %v223_v35 = vadd.f32 %v222_v33, %v193_v29 }
 0x14b   :  { %v226_v36 = vmax.f32 %v223_v35, 0.0 }
 0x14d   :  { %322 = vmatpush.msrb.mxu3 %v226_v36 }
 0x14f   :  { %323 = vmatpush.msrb.mxu3 %v225_v37 }
 0x150   :  { %2262 = vmatmul.msk.f32.vlgmr.msrb.gmra.mxu3 %vm283_vm2, %v227_v38 }
 0x158   :  { %2263 = vmatmul.msk.f32.gmra.mxu3 %vm283_vm2, %v228_v39 }
 0x160   :  { %2264 = vmatmul.msk.f32.gmra.mxu3 %vm283_vm2, %v229_v41 }
 0x168   :  { %2265 = vmatmul.msk.f32.gmra.mxu3 %vm283_vm2, %v230_v44 }
 0x170   :  { %2266 = vmatmul.msk.f32.gmra.mxu3 %vm283_vm2, %v231_v46 }
 0x178   :  { %2267 = vmatmul.msk.f32.gmra.mxu3 %vm283_vm2, %v232_v47 }
 0x180   :  { %2268 = vmatmul.msk.f32.gmra.mxu3 %vm283_vm2, %v233_v48 }
 0x188   :  { %2269 = vmatmul.msk.f32.gmra.mxu3 %vm283_vm2, %v234_v49 }
 0x1d3   :  { %v325_v57 = vpop.f32.mrf.mxu3 }
 0x1d4   :  { %v326_v58 = vadd.f32 %v325_v57, %v246_v56  ;;  %v518_v57 = vld [vmem:[#allocation4 + $0x150] sm:$0xff] }
 0x1d6   :  { %v2621_v59 = vmax.f32 %v326_v58, 0.0  ;;  %v519_v58 = vld [vmem:[#allocation4 + $0x158] sm:$0xff] }
 0x1d8   :  { %2270 = vmatmul.msk.f32.vlgmr.msra.gmra.mxu0 %vm47_vm0, %v2621_v59  ;;  %2278 = vmatmul.msk.f32.vlgmr.msrb.gmra.mxu1 %vm47_vm0, %v2621_v59 }
 0x1d9   :  { %2286 = vmatmul.msk.f32.vlgmr.msrb.gmra.mxu2 %vm47_vm0, %v2621_v59 }
 0x1db   :  { %v328_v61 = vpop.f32.mrf.mxu3 }
 0x1dc   :  { %v329_v62 = vadd.f32 %v328_v61, %v251_v60  ;;  %v510_v60 = vld [vmem:[#allocation4 + $0x110] sm:$0xff]  ;;  %v520_v61 = vld [vmem:[#allocation4 + $0x160] sm:$0xff] }
 0x1de   :  { %v2629_v63 = vmax.f32 %v329_v62, 0.0  ;;  %v511_v62 = vld [vmem:[#allocation4 + $0x118] sm:$0xff] }
 0x1e0   :  { %2271 = vmatmul.msk.f32.gmra.mxu0 %vm47_vm0, %v2629_v63  ;;  %2279 = vmatmul.msk.f32.gmra.mxu1 %vm47_vm0, %v2629_v63 }
 0x1e1   :  { %2287 = vmatmul.msk.f32.gmra.mxu2 %vm47_vm0, %v2629_v63 }
 0x1e3   :  { %v331_v1 = vpop.f32.mrf.mxu3 }
 0x1e4   :  { %v332_v2 = vadd.f32 %v331_v1, %v256_v0  ;;  %v521_v0 = vld [vmem:[#allocation4 + $0x168] sm:$0xff]  ;;  %v512_v1 = vld [vmem:[#allocation4 + $0x120] sm:$0xff] }
 0x1e6   :  { %v2637_v3 = vmax.f32 %v332_v2, 0.0  ;;  %v522_v2 = vld [vmem:[#allocation4 + $0x170] sm:$0xff] }
 0x1e8   :  { %2272 = vmatmul.msk.f32.gmra.mxu0 %vm47_vm0, %v2637_v3  ;;  %2280 = vmatmul.msk.f32.gmra.mxu1 %vm47_vm0, %v2637_v3 }
 0x1e9   :  { %2288 = vmatmul.msk.f32.gmra.mxu2 %vm47_vm0, %v2637_v3 }
 0x1eb   :  { %v334_v5 = vpop.f32.mrf.mxu3 }
 0x1ec   :  { %v335_v6 = vadd.f32 %v334_v5, %v261_v4  ;;  %v513_v4 = vld [vmem:[#allocation4 + $0x128] sm:$0xff]  ;;  %v523_v5 = vld [vmem:[#allocation4 + $0x178] sm:$0xff] }
 0x1ee   :  { %v2645_v7 = vmax.f32 %v335_v6, 0.0  ;;  %v514_v6 = vld [vmem:[#allocation4 + $0x130] sm:$0xff] }
 0x1f0   :  { %2273 = vmatmul.msk.f32.gmra.mxu0 %vm47_vm0, %v2645_v7  ;;  %2281 = vmatmul.msk.f32.gmra.mxu1 %vm47_vm0, %v2645_v7 }
 0x1f1   :  { %2289 = vmatmul.msk.f32.gmra.mxu2 %vm47_vm0, %v2645_v7 }
 0x1f3   :  { %v337_v9 = vpop.f32.mrf.mxu3 }
 0x1f4   :  { %v338_v10 = vadd.f32 %v337_v9, %v266_v8  ;;  %v524_v8 = vld [vmem:[#allocation4 + $0x180] sm:$0xff]  ;;  %v515_v9 = vld [vmem:[#allocation4 + $0x138] sm:$0xff] }
 0x1f6   :  { %v2653_v11 = vmax.f32 %v338_v10, 0.0  ;;  %v749_v10 = vld [vmem:[#allocation4 + $0xf8] sm:$0xff] }
 0x1f7   :  { %764 = vmatpush.msra.mxu2 %v749_v10 }
 0x1f8   :  { %2274 = vmatmul.msk.f32.gmra.mxu0 %vm47_vm0, %v2653_v11  ;;  %2282 = vmatmul.msk.f32.gmra.mxu1 %vm47_vm0, %v2653_v11 }
 0x1f9   :  { %2290 = vmatmul.msk.f32.gmra.mxu2 %vm47_vm0, %v2653_v11 }
 0x1fb   :  { %v340_v13 = vpop.f32.mrf.mxu3 }
 0x1fc   :  { %v341_v14 = vadd.f32 %v340_v13, %v271_v12  ;;  %v525_v12 = vld [vmem:[#allocation4 + $0x188] sm:$0xff]  ;;  %v516_v13 = vld [vmem:[#allocation4 + $0x140] sm:$0xff] }
 0x1fe   :  { %v2661_v15 = vmax.f32 %v341_v14, 0.0  ;;  %v517_v14 = vld [vmem:[#allocation4 + $0x148] sm:$0xff] }
 0x200   :  { %2275 = vmatmul.msk.f32.gmra.mxu0 %vm47_vm0, %v2661_v15  ;;  %2283 = vmatmul.msk.f32.gmra.mxu1 %vm47_vm0, %v2661_v15 }
 0x201   :  { %2291 = vmatmul.msk.f32.gmra.mxu2 %vm47_vm0, %v2661_v15 }
 0x203   :  { %v343_v17 = vpop.f32.mrf.mxu3 }
 0x204   :  { %v344_v18 = vadd.f32 %v343_v17, %v276_v16  ;;  %v682_v16 = vld [vmem:[#allocation4 + $0xe8] sm:$0xff] }
 0x205   :  { %v792_v17 = vld [vmem:[#allocation4 + $0x108] sm:$0xff]  ;;  %721 = vmatpush.msra.mxu1 %v682_v16 }
 0x206   :  { %v2669_v19 = vmax.f32 %v344_v18, 0.0  ;;  %v681_v18 = vld [vmem:[#allocation4 + $0xe0] sm:$0xff] }
 0x207   :  { %722 = vmatpush.msra.mxu1 %v681_v18 }
 0x208   :  { %2276 = vmatmul.msk.f32.gmra.mxu0 %vm47_vm0, %v2669_v19  ;;  %2284 = vmatmul.msk.f32.gmra.mxu1 %vm47_vm0, %v2669_v19 }
 0x209   :  { %2292 = vmatmul.msk.f32.gmra.mxu2 %vm47_vm0, %v2669_v19 }
 0x20b   :  { %v346_v23 = vpop.f32.mrf.mxu3 }
 0x20c   :  { %v347_v24 = vadd.f32 %v346_v23, %v281_v21  ;;  %v748_v21 = vld [vmem:[#allocation4 + $0xf0] sm:$0xff]  ;;  %v791_v23 = vld [vmem:[#allocation4 + $0x100] sm:$0xff] }
 0x20d   :  { %765 = vmatpush.msra.mxu2 %v748_v21 }
 0x20e   :  { %v2677_v25 = vmax.f32 %v347_v24, 0.0 }
 0x210   :  { %2277 = vmatmul.msk.f32.gmra.mxu0 %vm47_vm0, %v2677_v25  ;;  %2285 = vmatmul.msk.f32.gmra.mxu1 %vm47_vm0, %v2677_v25 }
 0x211   :  { %2293 = vmatmul.msk.f32.gmra.mxu2 %vm47_vm0, %v2677_v25 }
 0x255   :  { %v443_v26 = vpop.f32.mrf.mxu1  ;;  %v400_v27 = vpop.f32.mrf.mxu0 }
 0x25c   :  { %v486_v29 = vpop.f32.mrf.mxu2 }
 0x25d   :  { %v446_v30 = vpop.f32.mrf.mxu1  ;;  %v403_v32 = vpop.f32.mrf.mxu0 }
 0x264   :  { %v489_v33 = vpop.f32.mrf.mxu2 }
 0x265   :  { %v449_v34 = vpop.f32.mrf.mxu1  ;;  %v406_v35 = vpop.f32.mrf.mxu0 }
 0x26c   :  { %v492_v36 = vpop.f32.mrf.mxu2 }
 0x26d   :  { %v452_v37 = vpop.f32.mrf.mxu1  ;;  %v409_v39 = vpop.f32.mrf.mxu0 }
 0x274   :  { %v495_v38 = vpop.f32.mrf.mxu2 }
 0x275   :  { %v455_v41 = vpop.f32.mrf.mxu1  ;;  %v412_v47 = vpop.f32.mrf.mxu0 }
 0x27c   :  { %v498_v44 = vpop.f32.mrf.mxu2 }
 0x27d   :  { %v458_v46 = vpop.f32.mrf.mxu1  ;;  %v415_v50 = vpop.f32.mrf.mxu0 }
 0x284   :  { %v501_v48 = vpop.f32.mrf.mxu2 }
 0x285   :  { %v461_v49 = vpop.f32.mrf.mxu1  ;;  %v418_v53 = vpop.f32.mrf.mxu0 }
 0x28c   :  { %v504_v51 = vpop.f32.mrf.mxu2 }
 0x28d   :  { %v464_v52 = vpop.f32.mrf.mxu1  ;;  %v421_v56 = vpop.f32.mrf.mxu0 }
 0x28e   :  { %592 = vmatpush.msrb.mxu0 %v464_v52 }
 0x290   :  { %593 = vmatpush.msrb.mxu0 %v461_v49 }
 0x292   :  { %594 = vmatpush.msrb.mxu0 %v458_v46  ;;  %v643_v46 = vpop.permute.xlu1 %642 }
 0x294   :  { %v507_v54 = vpop.f32.mrf.mxu2  ;;  %595 = vmatpush.msrb.mxu0 %v455_v41 }
 0x295   :  { %559 = vmatpush.msra.mxu3 %v507_v54 }
 0x296   :  { %596 = vmatpush.msrb.mxu0 %v452_v37 }
 0x297   :  { %560 = vmatpush.msra.mxu3 %v504_v51 }
 0x298   :  { %597 = vmatpush.msrb.mxu0 %v449_v34 }
 0x299   :  { %561 = vmatpush.msra.mxu3 %v501_v48 }
 0x29a   :  { %598 = vmatpush.msrb.mxu0 %v446_v30 }
 0x29b   :  { %562 = vmatpush.msra.mxu3 %v498_v44 }
 0x29c   :  { %599 = vmatpush.msrb.mxu0 %v443_v26 }
 0x29d   :  { %563 = vmatpush.msra.mxu3 %v495_v38 }
 0x29e   :  { %600 = vmatpush.msrb.mxu0 %v421_v56 }
 0x29f   :  { %564 = vmatpush.msra.mxu3 %v492_v36  ;;  %v639_v36 = vpop.permute.xlu0 %638 }
 0x2a0   :  { %601 = vmatpush.msrb.mxu0 %v418_v53 }
 0x2a1   :  { %565 = vmatpush.msra.mxu3 %v489_v33 }
 0x2a2   :  { %602 = vmatpush.msrb.mxu0 %v415_v50 }
 0x2a3   :  { %566 = vmatpush.msra.mxu3 %v486_v29  ;;  %v635_v29 = vpop.permute.xlu2 %634 }
 0x2a4   :  { %603 = vmatpush.msrb.mxu0 %v412_v47  ;;  %2294 = vmatmul.msk.f32.vlgmr.msra.gmra.mxu3 %vm526_vm3, %v518_v57 }
 0x2a5   :  { %807 = vmatpush.msrb.mxu3 %v792_v17 }
 0x2a6   :  { %604 = vmatpush.msrb.mxu0 %v409_v39 }
 0x2a7   :  { %808 = vmatpush.msrb.mxu3 %v791_v23  ;;  %v659_v10 = vpop.permute.xlu0 %658 }
 0x2a8   :  { %605 = vmatpush.msrb.mxu0 %v406_v35 }
 0x2aa   :  { %606 = vmatpush.msrb.mxu0 %v403_v32 }
 0x2ab   :  { %v647_v52 = vpop.permute.xlu2 %646 }
 0x2ac   :  { %607 = vmatpush.msrb.mxu0 %v400_v27  ;;  %2295 = vmatmul.msk.f32.gmra.mxu3 %vm526_vm3, %v519_v58  ;;  %v651_v58 = vpop.permute.xlu1 %650 }
 0x2ad   :  { %608 = vmatmul.f32.vlgmr.msrb.gmra.mxu0 %v510_v60 }
 0x2b4   :  { %2296 = vmatmul.msk.f32.gmra.mxu3 %vm526_vm3, %v520_v61  ;;  %v663_v18 = vpop.permute.xlu1 %662 }
 0x2b5   :  { %611 = vmatmul.f32.gmra.mxu0 %v511_v62 }
 0x2bc   :  { %2297 = vmatmul.msk.f32.gmra.mxu3 %vm526_vm3, %v521_v0 }
 0x2bd   :  { %614 = vmatmul.f32.gmra.mxu0 %v512_v1 }
 0x2c4   :  { %2298 = vmatmul.msk.f32.gmra.mxu3 %vm526_vm3, %v522_v2  ;;  %v655_v2 = vpop.permute.xlu2 %654 }
 0x2c5   :  { %617 = vmatmul.f32.gmra.mxu0 %v513_v4 }
 0x2cc   :  { %2299 = vmatmul.msk.f32.gmra.mxu3 %vm526_vm3, %v523_v5 }
 0x2cd   :  { %620 = vmatmul.f32.gmra.mxu0 %v514_v6 }
 0x2d4   :  { %2300 = vmatmul.msk.f32.gmra.mxu3 %vm526_vm3, %v524_v8 }
 0x2d5   :  { %623 = vmatmul.f32.gmra.mxu0 %v515_v9 }
 0x2dc   :  { %2301 = vmatmul.msk.f32.gmra.mxu3 %vm526_vm3, %v525_v12 }
 0x2dd   :  { %626 = vmatmul.f32.gmra.mxu0 %v516_v13 }
 0x2e5   :  { %629 = vmatmul.f32.gmra.mxu0 %v517_v14 }
 0x327   :  { %v568_v24 = vpop.f32.mrf.mxu3 }
 0x32a   :  { %v609_v26 = vpop.f32.mrf.mxu0 }
 0x32b   :  { %v610_v27 = vadd.f32 %v609_v26, %v568_v24 }
 0x32d   :  { %v665_v30 = vadd.f32 %v635_v29, %v610_v27 }
 0x32f   :  { %v673_v32 = vmax.f32 %v665_v30, 0.0  ;;  %v571_v33 = vpop.f32.mrf.mxu3 }
 0x331   :  { %2302 = vmatmul.msk.f32.vlgmr.msra.gmra.mxu1 %vm47_vm0, %v673_v32  ;;  %2310 = vmatmul.msk.f32.vlgmr.msra.gmra.mxu2 %vm47_vm0, %v673_v32 }
 0x332   :  { %2318 = vmatmul.msk.f32.vlgmr.msrb.gmra.mxu3 %vm47_vm0, %v673_v32  ;;  %v612_v34 = vpop.f32.mrf.mxu0 }
 0x333   :  { %v613_v35 = vadd.f32 %v612_v34, %v571_v33 }
 0x335   :  { %v666_v37 = vadd.f32 %v639_v36, %v613_v35 }
 0x337   :  { %v674_v38 = vmax.f32 %v666_v37, 0.0  ;;  %v574_v39 = vpop.f32.mrf.mxu3 }
 0x339   :  { %2303 = vmatmul.msk.f32.gmra.mxu1 %vm47_vm0, %v674_v38  ;;  %2311 = vmatmul.msk.f32.gmra.mxu2 %vm47_vm0, %v674_v38 }
 0x33a   :  { %2319 = vmatmul.msk.f32.gmra.mxu3 %vm47_vm0, %v674_v38  ;;  %v615_v41 = vpop.f32.mrf.mxu0 }
 0x33b   :  { %v616_v44 = vadd.f32 %v615_v41, %v574_v39 }
 0x33d   :  { %v667_v47 = vadd.f32 %v643_v46, %v616_v44 }
 0x33f   :  { %v675_v48 = vmax.f32 %v667_v47, 0.0  ;;  %v577_v49 = vpop.f32.mrf.mxu3 }
 0x341   :  { %2304 = vmatmul.msk.f32.gmra.mxu1 %vm47_vm0, %v675_v48  ;;  %2312 = vmatmul.msk.f32.gmra.mxu2 %vm47_vm0, %v675_v48 }
 0x342   :  { %2320 = vmatmul.msk.f32.gmra.mxu3 %vm47_vm0, %v675_v48  ;;  %v618_v50 = vpop.f32.mrf.mxu0 }
 0x343   :  { %v619_v51 = vadd.f32 %v618_v50, %v577_v49 }
 0x345   :  { %v668_v53 = vadd.f32 %v647_v52, %v619_v51 }
 0x347   :  { %v676_v54 = vmax.f32 %v668_v53, 0.0  ;;  %v580_v55 = vpop.f32.mrf.mxu3 }
 0x349   :  { %2305 = vmatmul.msk.f32.gmra.mxu1 %vm47_vm0, %v676_v54  ;;  %2313 = vmatmul.msk.f32.gmra.mxu2 %vm47_vm0, %v676_v54 }
 0x34a   :  { %2321 = vmatmul.msk.f32.gmra.mxu3 %vm47_vm0, %v676_v54  ;;  %v621_v56 = vpop.f32.mrf.mxu0  ;;  %v2551_v54 = vmov 3  }
 0x34b   :  { %v622_v57 = vadd.f32 %v621_v56, %v580_v55  ;;  %2473 = vset.pattern.permute.xlu1 %v2551_v54  ;;  %2472 = vset.pattern.permute.xlu0 %v2551_v54  ;;  %v842_v55 = vld [vmem:[#allocation4 + $0x1d0] sm:$0xff] }
 0x34c   :  { %965 = vperm.xlu1 %2473, %v2603_v40   ;;  %961 = vperm.xlu0 %2472, %v2587_v20   ;;  %v834_v20 = vld [vmem:[#allocation4 + $0x190] sm:$0xff] }
 0x34d   :  { %v669_v60 = vadd.f32 %v651_v58, %v622_v57  ;;  %2471 = vset.pattern.permute.xlu2 %v2551_v54  ;;  %v843_v57 = vld [vmem:[#allocation4 + $0x1d8] sm:$0xff] }
 0x34e   :  { %957 = vperm.xlu2 %2471, %v2590_v22   ;;  %v844_v22 = vld [vmem:[#allocation4 + $0x1e0] sm:$0xff]  ;;  %v835_v58 = vld [vmem:[#allocation4 + $0x198] sm:$0xff] }
 0x34f   :  { %v677_v61 = vmax.f32 %v669_v60, 0.0  ;;  %v583_v62 = vpop.f32.mrf.mxu3  ;;  %v845_v60 = vld [vmem:[#allocation4 + $0x1e8] sm:$0xff] }
 0x351   :  { %2306 = vmatmul.msk.f32.gmra.mxu1 %vm47_vm0, %v677_v61  ;;  %2314 = vmatmul.msk.f32.gmra.mxu2 %vm47_vm0, %v677_v61 }
 0x352   :  { %2322 = vmatmul.msk.f32.gmra.mxu3 %vm47_vm0, %v677_v61  ;;  %v624_v0 = vpop.f32.mrf.mxu0  ;;  %v836_v61 = vld [vmem:[#allocation4 + $0x1a0] sm:$0xff] }
 0x353   :  { %v625_v1 = vadd.f32 %v624_v0, %v583_v62  ;;  %v846_v62 = vld [vmem:[#allocation4 + $0x1f0] sm:$0xff]  ;;  %v847_v0 = vld [vmem:[#allocation4 + $0x1f8] sm:$0xff] }
 0x354   :  { %973 = vperm.xlu1 %2473, %v2609_v43   ;;  %981 = vperm.xlu0 %2472, %v2614_v45  }
 0x355   :  { %v670_v4 = vadd.f32 %v655_v2, %v625_v1  ;;  %v848_v1 = vld [vmem:[#allocation4 + $0x200] sm:$0xff]  ;;  %v839_v2 = vld [vmem:[#allocation4 + $0x1b8] sm:$0xff] }
 0x356   :  { %969 = vperm.xlu2 %2471, %v2607_v42  }
 0x357   :  { %v678_v5 = vmax.f32 %v670_v4, 0.0  ;;  %v586_v6 = vpop.f32.mrf.mxu3  ;;  %v849_v4 = vld [vmem:[#allocation4 + $0x208] sm:$0xff] }
 0x359   :  { %2307 = vmatmul.msk.f32.gmra.mxu1 %vm47_vm0, %v678_v5  ;;  %2315 = vmatmul.msk.f32.gmra.mxu2 %vm47_vm0, %v678_v5 }
 0x35a   :  { %2323 = vmatmul.msk.f32.gmra.mxu3 %vm47_vm0, %v678_v5  ;;  %v627_v8 = vpop.f32.mrf.mxu0  ;;  %v840_v5 = vld [vmem:[#allocation4 + $0x1c0] sm:$0xff] }
 0x35b   :  { %v628_v9 = vadd.f32 %v627_v8, %v586_v6  ;;  %v1080_v6 = vld [vmem:[#allocation4 + $0x228] sm:$0xff] }
 0x35c   :  { %985 = vperm.xlu1 %2473, %v2598_v31   ;;  %v837_v31 = vld [vmem:[#allocation4 + $0x1a8] sm:$0xff]  ;;  %1095 = vmatpush.msra.mxu3 %v1080_v6 }
 0x35d   :  { %v671_v12 = vadd.f32 %v659_v10, %v628_v9  ;;  %v841_v8 = vld [vmem:[#allocation4 + $0x1c8] sm:$0xff]  ;;  %v1013_v9 = vld [vmem:[#allocation4 + $0x218] sm:$0xff] }
 0x35e   :  { %977 = vperm.xlu2 %2471, %v2595_v28   ;;  %v838_v28 = vld [vmem:[#allocation4 + $0x1b0] sm:$0xff]  ;;  %v1123_v10 = vld [vmem:[#allocation4 + $0x238] sm:$0xff]  ;;  %1052 = vmatpush.msrb.mxu2 %v1013_v9 }
 0x35f   :  { %v679_v13 = vmax.f32 %v671_v12, 0.0  ;;  %v589_v14 = vpop.f32.mrf.mxu3  ;;  %v1012_v12 = vld [vmem:[#allocation4 + $0x210] sm:$0xff] }
 0x360   :  { %1053 = vmatpush.msrb.mxu2 %v1012_v12 }
 0x361   :  { %2308 = vmatmul.msk.f32.gmra.mxu1 %vm47_vm0, %v679_v13  ;;  %2316 = vmatmul.msk.f32.gmra.mxu2 %vm47_vm0, %v679_v13 }
 0x362   :  { %2324 = vmatmul.msk.f32.gmra.mxu3 %vm47_vm0, %v679_v13  ;;  %v630_v16 = vpop.f32.mrf.mxu0  ;;  %v1079_v13 = vld [vmem:[#allocation4 + $0x220] sm:$0xff] }
 0x363   :  { %v631_v17 = vadd.f32 %v630_v16, %v589_v14  ;;  %v1122_v14 = vld [vmem:[#allocation4 + $0x230] sm:$0xff]  ;;  %1096 = vmatpush.msra.mxu3 %v1079_v13 }
 0x365   :  { %v672_v21 = vadd.f32 %v663_v18, %v631_v17 }
 0x367   :  { %v680_v23 = vmax.f32 %v672_v21, 0.0 }
 0x369   :  { %2309 = vmatmul.msk.f32.gmra.mxu1 %vm47_vm0, %v680_v23  ;;  %2317 = vmatmul.msk.f32.gmra.mxu2 %vm47_vm0, %v680_v23 }
 0x36a   :  { %2325 = vmatmul.msk.f32.gmra.mxu3 %vm47_vm0, %v680_v23 }
 0x3a8   :  { %v958_v23 = vpop.permute.xlu2 %957 }
 0x3ae   :  { %v724_v27 = vpop.f32.mrf.mxu1 }
 0x3b4   :  { %v767_v24 = vpop.f32.mrf.mxu2 }
 0x3b5   :  { %v810_v26 = vpop.f32.mrf.mxu3 }
 0x3b6   :  { %v727_v32 = vpop.f32.mrf.mxu1 }
 0x3bc   :  { %v770_v29 = vpop.f32.mrf.mxu2 }
 0x3bd   :  { %v813_v30 = vpop.f32.mrf.mxu3 }
 0x3be   :  { %v730_v35 = vpop.f32.mrf.mxu1 }
 0x3c4   :  { %v773_v33 = vpop.f32.mrf.mxu2 }
 0x3c5   :  { %v816_v34 = vpop.f32.mrf.mxu3 }
 0x3c6   :  { %v733_v38 = vpop.f32.mrf.mxu1 }
 0x3cc   :  { %v776_v36 = vpop.f32.mrf.mxu2 }
 0x3cd   :  { %v819_v37 = vpop.f32.mrf.mxu3 }
 0x3ce   :  { %v736_v47 = vpop.f32.mrf.mxu1 }
 0x3d4   :  { %v779_v39 = vpop.f32.mrf.mxu2 }
 0x3d5   :  { %v822_v41 = vpop.f32.mrf.mxu3 }
 0x3d6   :  { %v739_v50 = vpop.f32.mrf.mxu1 }
 0x3dc   :  { %v782_v44 = vpop.f32.mrf.mxu2 }
 0x3dd   :  { %v825_v46 = vpop.f32.mrf.mxu3 }
 0x3de   :  { %v742_v53 = vpop.f32.mrf.mxu1 }
 0x3e4   :  { %v785_v48 = vpop.f32.mrf.mxu2 }
 0x3e5   :  { %v828_v49 = vpop.f32.mrf.mxu3 }
 0x3e6   :  { %v745_v56 = vpop.f32.mrf.mxu1 }
 0x3ec   :  { %v788_v51 = vpop.f32.mrf.mxu2 }
 0x3ed   :  { %v831_v52 = vpop.f32.mrf.mxu3  ;;  %915 = vmatpush.msrb.mxu1 %v788_v51 }
 0x3ee   :  { %882 = vmatpush.msra.mxu0 %v831_v52 }
 0x3ef   :  { %916 = vmatpush.msrb.mxu1 %v785_v48 }
 0x3f0   :  { %883 = vmatpush.msra.mxu0 %v828_v49  ;;  %v970_v49 = vpop.permute.xlu2 %969 }
 0x3f1   :  { %917 = vmatpush.msrb.mxu1 %v782_v44 }
 0x3f2   :  { %884 = vmatpush.msra.mxu0 %v825_v46 }
 0x3f3   :  { %918 = vmatpush.msrb.mxu1 %v779_v39  ;;  %v966_v39 = vpop.permute.xlu1 %965 }
 0x3f4   :  { %885 = vmatpush.msra.mxu0 %v822_v41 }
 0x3f5   :  { %919 = vmatpush.msrb.mxu1 %v776_v36 }
 0x3f6   :  { %886 = vmatpush.msra.mxu0 %v819_v37 }
 0x3f7   :  { %920 = vmatpush.msrb.mxu1 %v773_v33  ;;  %v962_v33 = vpop.permute.xlu0 %961 }
 0x3f8   :  { %887 = vmatpush.msra.mxu0 %v816_v34 }
 0x3f9   :  { %921 = vmatpush.msrb.mxu1 %v770_v29 }
 0x3fa   :  { %888 = vmatpush.msra.mxu0 %v813_v30 }
 0x3fb   :  { %922 = vmatpush.msrb.mxu1 %v767_v24  ;;  %v974_v54 = vpop.permute.xlu1 %973 }
 0x3fc   :  { %889 = vmatpush.msra.mxu0 %v810_v26 }
 0x3fd   :  { %923 = vmatpush.msrb.mxu1 %v745_v56  ;;  %2326 = vmatmul.msk.f32.vlgmr.msra.gmra.mxu0 %vm526_vm3, %v842_v55 }
 0x3fe   :  { %1138 = vmatpush.msrb.mxu0 %v1123_v10 }
 0x3ff   :  { %924 = vmatpush.msrb.mxu1 %v742_v53 }
 0x400   :  { %1139 = vmatpush.msrb.mxu0 %v1122_v14 }
 0x401   :  { %925 = vmatpush.msrb.mxu1 %v739_v50 }
 0x403   :  { %926 = vmatpush.msrb.mxu1 %v736_v47 }
 0x405   :  { %927 = vmatpush.msrb.mxu1 %v733_v38  ;;  %2327 = vmatmul.msk.f32.gmra.mxu0 %vm526_vm3, %v843_v57 }
 0x407   :  { %928 = vmatpush.msrb.mxu1 %v730_v35 }
 0x409   :  { %929 = vmatpush.msrb.mxu1 %v727_v32 }
 0x40b   :  { %930 = vmatpush.msrb.mxu1 %v724_v27 }
 0x40c   :  { %931 = vmatmul.f32.vlgmr.msrb.gmra.mxu1 %v834_v20 }
 0x40d   :  { %2328 = vmatmul.msk.f32.gmra.mxu0 %vm526_vm3, %v844_v22 }
 0x414   :  { %934 = vmatmul.f32.gmra.mxu1 %v835_v58  ;;  %v978_v58 = vpop.permute.xlu2 %977 }
 0x415   :  { %2329 = vmatmul.msk.f32.gmra.mxu0 %vm526_vm3, %v845_v60 }
 0x41c   :  { %937 = vmatmul.f32.gmra.mxu1 %v836_v61 }
 0x41d   :  { %2330 = vmatmul.msk.f32.gmra.mxu0 %vm526_vm3, %v846_v62 }
 0x424   :  { %940 = vmatmul.f32.gmra.mxu1 %v837_v31 }
 0x425   :  { %2331 = vmatmul.msk.f32.gmra.mxu0 %vm526_vm3, %v847_v0 }
 0x42c   :  { %943 = vmatmul.f32.gmra.mxu1 %v838_v28  ;;  %v982_v28 = vpop.permute.xlu0 %981 }
 0x42d   :  { %2332 = vmatmul.msk.f32.gmra.mxu0 %vm526_vm3, %v848_v1 }
 0x434   :  { %946 = vmatmul.f32.gmra.mxu1 %v839_v2 }
 0x435   :  { %2333 = vmatmul.msk.f32.gmra.mxu0 %vm526_vm3, %v849_v4 }
 0x43c   :  { %949 = vmatmul.f32.gmra.mxu1 %v840_v5 }
 0x444   :  { %952 = vmatmul.f32.gmra.mxu1 %v841_v8  ;;  %v986_v8 = vpop.permute.xlu1 %985 }
 0x47a   :  { %v891_v16 = vpop.f32.mrf.mxu0 }
 0x482   :  { %v894_v17 = vpop.f32.mrf.mxu0 }
 0x489   :  { %v932_v18 = vpop.f32.mrf.mxu1 }
 0x48a   :  { %v933_v21 = vadd.f32 %v932_v18, %v891_v16  ;;  %v897_v26 = vpop.f32.mrf.mxu0 }
 0x48c   :  { %v988_v24 = vadd.f32 %v958_v23, %v933_v21 }
 0x48e   :  { %v996_v27 = vmax.f32 %v988_v24, 0.0 }
 0x490   :  { %v2742_v29 = vadd.f32 %v996_v27, %v2621_v59 }
 0x491   :  { %v935_v30 = vpop.f32.mrf.mxu1 }
 0x492   :  { %v936_v32 = vadd.f32 %v935_v30, %v894_v17  ;;  %2334 = vmatmul.msk.f32.vlgmr.msrb.gmra.mxu2 %vm47_vm0, %v2742_v29  ;;  %2342 = vmatmul.msk.f32.vlgmr.msra.gmra.mxu3 %vm47_vm0, %v2742_v29  ;;  %v900_v36 = vpop.f32.mrf.mxu0 }
 0x493   :  { %2350 = vmatmul.msk.f32.vlgmr.msrb.gmra.mxu0 %vm47_vm0, %v2742_v29 }
 0x494   :  { %v989_v34 = vadd.f32 %v962_v33, %v936_v32 }
 0x496   :  { %v997_v35 = vmax.f32 %v989_v34, 0.0 }
 0x498   :  { %v2751_v37 = vadd.f32 %v997_v35, %v2629_v63 }
 0x499   :  { %v938_v59 = vpop.f32.mrf.mxu1 }
 0x49a   :  { %v939_v38 = vadd.f32 %v938_v59, %v897_v26  ;;  %2335 = vmatmul.msk.f32.gmra.mxu2 %vm47_vm0, %v2751_v37  ;;  %2343 = vmatmul.msk.f32.gmra.mxu3 %vm47_vm0, %v2751_v37  ;;  %v903_v63 = vpop.f32.mrf.mxu0 }
 0x49b   :  { %2351 = vmatmul.msk.f32.gmra.mxu0 %vm47_vm0, %v2751_v37 }
 0x49c   :  { %v990_v41 = vadd.f32 %v966_v39, %v939_v38 }
 0x49e   :  { %v998_v44 = vmax.f32 %v990_v41, 0.0 }
 0x4a0   :  { %v2760_v46 = vadd.f32 %v998_v44, %v2637_v3 }
 0x4a1   :  { %v941_v47 = vpop.f32.mrf.mxu1 }
 0x4a2   :  { %v942_v48 = vadd.f32 %v941_v47, %v900_v36  ;;  %2336 = vmatmul.msk.f32.gmra.mxu2 %vm47_vm0, %v2760_v46  ;;  %2344 = vmatmul.msk.f32.gmra.mxu3 %vm47_vm0, %v2760_v46  ;;  %v906_v55 = vpop.f32.mrf.mxu0  ;;  %v1173_v47 = vld [vmem:[#allocation4 + $0x2b0] sm:$0xff] }
 0x4a3   :  { %2352 = vmatmul.msk.f32.gmra.mxu0 %vm47_vm0, %v2760_v46 }
 0x4a4   :  { %v991_v50 = vadd.f32 %v970_v49, %v942_v48  ;;  %v1174_v48 = vld [vmem:[#allocation4 + $0x2b8] sm:$0xff]  ;;  %v2552_v49 = vmov 4  }
 0x4a5   :  { %2476 = vset.pattern.permute.xlu1 %v2552_v49  ;;  %2475 = vset.pattern.permute.xlu0 %v2552_v49 }
 0x4a6   :  { %v999_v51 = vmax.f32 %v991_v50, 0.0  ;;  %1296 = vperm.xlu1 %2476, %v2603_v40   ;;  %v2818_v50 = vld [vmem:[#allocation4 + $0x498] sm:$0xff]  ;;  %2474 = vset.pattern.permute.xlu2 %v2552_v49  ;;  %v1165_v40 = vld [vmem:[#allocation4 + $0x270] sm:$0xff] }
 0x4a7   :  { %1292 = vperm.xlu0 %2475, %v2818_v50  }
 0x4a8   :  { %v2769_v52 = vadd.f32 %v999_v51, %v2645_v7  ;;  %v2821_v51 = vld [vmem:[#allocation4 + $0x490] sm:$0xff] }
 0x4a9   :  { %v944_v3 = vpop.f32.mrf.mxu1  ;;  %1288 = vperm.xlu2 %2474, %v2821_v51  }
 0x4aa   :  { %v945_v53 = vadd.f32 %v944_v3, %v903_v63  ;;  %2337 = vmatmul.msk.f32.gmra.mxu2 %vm47_vm0, %v2769_v52  ;;  %2345 = vmatmul.msk.f32.gmra.mxu3 %vm47_vm0, %v2769_v52  ;;  %v909_v61 = vpop.f32.mrf.mxu0  ;;  %v1175_v3 = vld [vmem:[#allocation4 + $0x2c0] sm:$0xff] }
 0x4ab   :  { %2353 = vmatmul.msk.f32.gmra.mxu0 %vm47_vm0, %v2769_v52 }
 0x4ac   :  { %v992_v56 = vadd.f32 %v974_v54, %v945_v53  ;;  %v1176_v53 = vld [vmem:[#allocation4 + $0x2c8] sm:$0xff] }
 0x4ad   :  { %v2829_v54 = vld [vmem:[#allocation4 + $0x4c8] sm:$0xff] }
 0x4ae   :  { %v1000_v57 = vmax.f32 %v992_v56, 0.0  ;;  %1304 = vperm.xlu1 %2476, %v2609_v43   ;;  %v1166_v43 = vld [vmem:[#allocation4 + $0x278] sm:$0xff] }
 0x4af   :  { %1312 = vperm.xlu0 %2475, %v2614_v45   ;;  %v1177_v45 = vld [vmem:[#allocation4 + $0x2d0] sm:$0xff]  ;;  %v1178_v56 = vld [vmem:[#allocation4 + $0x2d8] sm:$0xff] }
 0x4b0   :  { %v2778_v20 = vadd.f32 %v1000_v57, %v2653_v11  ;;  %v1168_v57 = vld [vmem:[#allocation4 + $0x288] sm:$0xff] }
 0x4b1   :  { %v947_v7 = vpop.f32.mrf.mxu1  ;;  %1300 = vperm.xlu2 %2474, %v2607_v42   ;;  %v1167_v42 = vld [vmem:[#allocation4 + $0x280] sm:$0xff] }
 0x4b2   :  { %v948_v22 = vadd.f32 %v947_v7, %v906_v55  ;;  %2338 = vmatmul.msk.f32.gmra.mxu2 %vm47_vm0, %v2778_v20  ;;  %2346 = vmatmul.msk.f32.gmra.mxu3 %vm47_vm0, %v2778_v20  ;;  %v912_v4 = vpop.f32.mrf.mxu0  ;;  %v2833_v55 = vld [vmem:[#allocation4 + $0x4b8] sm:$0xff]  ;;  %v1179_v7 = vld [vmem:[#allocation4 + $0x2e0] sm:$0xff] }
 0x4b3   :  { %2354 = vmatmul.msk.f32.gmra.mxu0 %vm47_vm0, %v2778_v20 }
 0x4b4   :  { %v993_v60 = vadd.f32 %v978_v58, %v948_v22  ;;  %v1169_v22 = vld [vmem:[#allocation4 + $0x290] sm:$0xff]  ;;  %v1180_v58 = vld [vmem:[#allocation4 + $0x2e8] sm:$0xff] }
 0x4b6   :  { %v1001_v62 = vmax.f32 %v993_v60, 0.0  ;;  %1316 = vperm.xlu1 %2476, %v2829_v54   ;;  %v1170_v60 = vld [vmem:[#allocation4 + $0x298] sm:$0xff] }
 0x4b8   :  { %v2787_v31 = vadd.f32 %v1001_v62, %v2661_v15  ;;  %v1403_v62 = vld [vmem:[#allocation4 + $0x258] sm:$0xff] }
 0x4b9   :  { %v950_v11 = vpop.f32.mrf.mxu1  ;;  %1308 = vperm.xlu2 %2474, %v2833_v55   ;;  %1418 = vmatpush.msra.mxu0 %v1403_v62 }
 0x4ba   :  { %v951_v0 = vadd.f32 %v950_v11, %v909_v61  ;;  %2339 = vmatmul.msk.f32.gmra.mxu2 %vm47_vm0, %v2787_v31  ;;  %2347 = vmatmul.msk.f32.gmra.mxu3 %vm47_vm0, %v2787_v31  ;;  %v1171_v61 = vld [vmem:[#allocation4 + $0x2a0] sm:$0xff]  ;;  %v1172_v11 = vld [vmem:[#allocation4 + $0x2a8] sm:$0xff] }
 0x4bb   :  { %2355 = vmatmul.msk.f32.gmra.mxu0 %vm47_vm0, %v2787_v31 }
 0x4bc   :  { %v994_v1 = vadd.f32 %v982_v28, %v951_v0  ;;  %v1336_v0 = vld [vmem:[#allocation4 + $0x248] sm:$0xff] }
 0x4bd   :  { %v1446_v28 = vld [vmem:[#allocation4 + $0x268] sm:$0xff]  ;;  %1375 = vmatpush.msrb.mxu3 %v1336_v0 }
 0x4be   :  { %v1002_v2 = vmax.f32 %v994_v1, 0.0  ;;  %v1335_v1 = vld [vmem:[#allocation4 + $0x240] sm:$0xff] }
 0x4bf   :  { %1376 = vmatpush.msrb.mxu3 %v1335_v1 }
 0x4c0   :  { %v2796_v5 = vadd.f32 %v1002_v2, %v2669_v19  ;;  %v1402_v2 = vld [vmem:[#allocation4 + $0x250] sm:$0xff] }
 0x4c1   :  { %v953_v15 = vpop.f32.mrf.mxu1  ;;  %1419 = vmatpush.msra.mxu0 %v1402_v2 }
 0x4c2   :  { %v954_v6 = vadd.f32 %v953_v15, %v912_v4  ;;  %2340 = vmatmul.msk.f32.gmra.mxu2 %vm47_vm0, %v2796_v5  ;;  %2348 = vmatmul.msk.f32.gmra.mxu3 %vm47_vm0, %v2796_v5  ;;  %v1445_v4 = vld [vmem:[#allocation4 + $0x260] sm:$0xff] }
 0x4c3   :  { %2356 = vmatmul.msk.f32.gmra.mxu0 %vm47_vm0, %v2796_v5 }
 0x4c4   :  { %v995_v9 = vadd.f32 %v986_v8, %v954_v6 }
 0x4c6   :  { %v1003_v10 = vmax.f32 %v995_v9, 0.0 }
 0x4c8   :  { %v2805_v12 = vadd.f32 %v1003_v10, %v2677_v25 }
 0x4ca   :  { %2341 = vmatmul.msk.f32.gmra.mxu2 %vm47_vm0, %v2805_v12  ;;  %2349 = vmatmul.msk.f32.gmra.mxu3 %vm47_vm0, %v2805_v12 }
 0x4cb   :  { %2357 = vmatmul.msk.f32.gmra.mxu0 %vm47_vm0, %v2805_v12 }
 0x503   :  { %v1289_v10 = vpop.permute.xlu2 %1288 }
 0x510   :  { %v1141_v19 = vpop.f32.mrf.mxu0 }
 0x515   :  { %v1098_v13 = vpop.f32.mrf.mxu3  ;;  %v2813_v14 = vpop.f32.mrf.mxu2 }
 0x518   :  { %v1144_v16 = vpop.f32.mrf.mxu0 }
 0x51d   :  { %v1101_v17 = vpop.f32.mrf.mxu3  ;;  %v1058_v21 = vpop.f32.mrf.mxu2 }
 0x520   :  { %v1147_v18 = vpop.f32.mrf.mxu0 }
 0x525   :  { %v1104_v23 = vpop.f32.mrf.mxu3  ;;  %v1061_v24 = vpop.f32.mrf.mxu2 }
 0x528   :  { %v1150_v25 = vpop.f32.mrf.mxu0 }
 0x52d   :  { %v1107_v26 = vpop.f32.mrf.mxu3  ;;  %v1064_v30 = vpop.f32.mrf.mxu2 }
 0x530   :  { %v1153_v27 = vpop.f32.mrf.mxu0 }
 0x535   :  { %v1110_v32 = vpop.f32.mrf.mxu3  ;;  %v1067_v35 = vpop.f32.mrf.mxu2 }
 0x538   :  { %v1156_v33 = vpop.f32.mrf.mxu0 }
 0x53d   :  { %v1113_v34 = vpop.f32.mrf.mxu3  ;;  %v1070_v39 = vpop.f32.mrf.mxu2 }
 0x540   :  { %v1159_v36 = vpop.f32.mrf.mxu0 }
 0x545   :  { %v1116_v59 = vpop.f32.mrf.mxu3  ;;  %v1073_v44 = vpop.f32.mrf.mxu2 }
 0x548   :  { %v1162_v38 = vpop.f32.mrf.mxu0 }
 0x549   :  { %1213 = vmatpush.msra.mxu1 %v1162_v38 }
 0x54b   :  { %1214 = vmatpush.msra.mxu1 %v1159_v36  ;;  %v1301_v36 = vpop.permute.xlu2 %1300 }
 0x54d   :  { %1215 = vmatpush.msra.mxu1 %v1156_v33  ;;  %v1119_v41 = vpop.f32.mrf.mxu3  ;;  %v1076_v63 = vpop.f32.mrf.mxu2 }
 0x54e   :  { %1246 = vmatpush.msra.mxu2 %v1119_v41  ;;  %v1659_v41 = vld [vmem:[#allocation4 + $0x378] sm:$0xff] }
 0x54f   :  { %1216 = vmatpush.msra.mxu1 %v1153_v27  ;;  %v1297_v27 = vpop.permute.xlu1 %1296  ;;  %1674 = vmatpush.msrb.mxu0 %v1659_v41  ;;  %v1490_v41 = vld [vmem:[#allocation4 + $0x300] sm:$0xff] }
 0x550   :  { %1247 = vmatpush.msra.mxu2 %v1116_v59 }
 0x551   :  { %1217 = vmatpush.msra.mxu1 %v1150_v25 }
 0x552   :  { %1248 = vmatpush.msra.mxu2 %v1113_v34 }
 0x553   :  { %1218 = vmatpush.msra.mxu1 %v1147_v18  ;;  %v1293_v18 = vpop.permute.xlu0 %1292 }
 0x554   :  { %1249 = vmatpush.msra.mxu2 %v1110_v32 }
 0x555   :  { %1219 = vmatpush.msra.mxu1 %v1144_v16 }
 0x556   :  { %1250 = vmatpush.msra.mxu2 %v1107_v26 }
 0x557   :  { %1220 = vmatpush.msra.mxu1 %v1141_v19 }
 0x558   :  { %1251 = vmatpush.msra.mxu2 %v1104_v23  ;;  %2358 = vmatmul.msk.f32.vlgmr.msra.gmra.mxu1 %vm526_vm3, %v1173_v47 }
 0x559   :  { %1461 = vmatpush.msrb.mxu1 %v1446_v28 }
 0x55a   :  { %1252 = vmatpush.msra.mxu2 %v1101_v17 }
 0x55b   :  { %1462 = vmatpush.msrb.mxu1 %v1445_v4 }
 0x55c   :  { %1253 = vmatpush.msra.mxu2 %v1098_v13 }
 0x55e   :  { %1254 = vmatpush.msra.mxu2 %v1076_v63  ;;  %v1305_v63 = vpop.permute.xlu1 %1304 }
 0x560   :  { %1255 = vmatpush.msra.mxu2 %v1073_v44  ;;  %2359 = vmatmul.msk.f32.gmra.mxu1 %vm526_vm3, %v1174_v48  ;;  %v1658_v44 = vld [vmem:[#allocation4 + $0x370] sm:$0xff] }
 0x561   :  { %1675 = vmatpush.msrb.mxu0 %v1658_v44  ;;  %v1500_v44 = vld [vmem:[#allocation4 + $0x350] sm:$0xff] }
 0x562   :  { %1256 = vmatpush.msra.mxu2 %v1070_v39 }
 0x564   :  { %1257 = vmatpush.msra.mxu2 %v1067_v35 }
 0x566   :  { %1258 = vmatpush.msra.mxu2 %v1064_v30  ;;  %v1317_v0 = vpop.permute.xlu1 %1316 }
 0x568   :  { %1259 = vmatpush.msra.mxu2 %v1061_v24  ;;  %2360 = vmatmul.msk.f32.gmra.mxu1 %vm526_vm3, %v1175_v3 }
 0x56a   :  { %1260 = vmatpush.msra.mxu2 %v1058_v21 }
 0x56c   :  { %1261 = vmatpush.msra.mxu2 %v2813_v14 }
 0x56d   :  { %1262 = vmatmul.f32.vlgmr.msra.gmra.mxu2 %v1165_v40 }
 0x570   :  { %2361 = vmatmul.msk.f32.gmra.mxu1 %vm526_vm3, %v1176_v53 }
 0x575   :  { %1265 = vmatmul.f32.gmra.mxu2 %v1166_v43  ;;  %v1309_v43 = vpop.permute.xlu2 %1308 }
 0x578   :  { %2362 = vmatmul.msk.f32.gmra.mxu1 %vm526_vm3, %v1177_v45 }
 0x57d   :  { %1268 = vmatmul.f32.gmra.mxu2 %v1167_v42 }
 0x580   :  { %2363 = vmatmul.msk.f32.gmra.mxu1 %vm526_vm3, %v1178_v56 }
 0x585   :  { %1271 = vmatmul.f32.gmra.mxu2 %v1168_v57 }
 0x588   :  { %2364 = vmatmul.msk.f32.gmra.mxu1 %vm526_vm3, %v1179_v7 }
 0x58d   :  { %1274 = vmatmul.f32.gmra.mxu2 %v1169_v22  ;;  %v1313_v22 = vpop.permute.xlu0 %1312 }
 0x590   :  { %2365 = vmatmul.msk.f32.gmra.mxu1 %vm526_vm3, %v1180_v58 }
 0x595   :  { %1277 = vmatmul.f32.gmra.mxu2 %v1170_v60 }
 0x59d   :  { %1280 = vmatmul.f32.gmra.mxu2 %v1171_v61 }
 0x5a5   :  { %1283 = vmatmul.f32.gmra.mxu2 %v1172_v11 }
 0x5d5   :  { %v1222_v15 = vpop.f32.mrf.mxu1 }
 0x5dd   :  { %v1225_v6 = vpop.f32.mrf.mxu1 }
 0x5e5   :  { %v1228_v13 = vpop.f32.mrf.mxu1 }
 0x5ed   :  { %v1231_v25 = vpop.f32.mrf.mxu1 }
 0x5f0   :  { %v1263_v8 = vpop.f32.mrf.mxu2 }
 0x5f1   :  { %v1264_v9 = vadd.f32 %v1263_v8, %v1222_v15 }
 0x5f3   :  { %v1319_v19 = vadd.f32 %v1289_v10, %v1264_v9 }
 0x5f5   :  { %v1327_v14 = vmax.f32 %v1319_v19, 0.0  ;;  %v1234_v34 = vpop.f32.mrf.mxu1 }
 0x5f7   :  { %2366 = vmatmul.msk.f32.vlgmr.msrb.gmra.mxu3 %vm47_vm0, %v1327_v14  ;;  %2374 = vmatmul.msk.f32.vlgmr.msra.gmra.mxu0 %vm47_vm0, %v1327_v14 }
 0x5f8   :  { %2382 = vmatmul.msk.f32.vlgmr.msrb.gmra.mxu1 %vm47_vm0, %v1327_v14  ;;  %v1266_v16 = vpop.f32.mrf.mxu2 }
 0x5f9   :  { %v1267_v17 = vadd.f32 %v1266_v16, %v1225_v6 }
 0x5fb   :  { %v1320_v21 = vadd.f32 %v1293_v18, %v1267_v17 }
 0x5fd   :  { %v1328_v23 = vmax.f32 %v1320_v21, 0.0  ;;  %v1237_v48 = vpop.f32.mrf.mxu1 }
 0x5ff   :  { %2367 = vmatmul.msk.f32.gmra.mxu3 %vm47_vm0, %v1328_v23  ;;  %2375 = vmatmul.msk.f32.gmra.mxu0 %vm47_vm0, %v1328_v23 }
 0x600   :  { %2383 = vmatmul.msk.f32.gmra.mxu1 %vm47_vm0, %v1328_v23  ;;  %v1269_v24 = vpop.f32.mrf.mxu2 }
 0x601   :  { %v1270_v26 = vadd.f32 %v1269_v24, %v1228_v13  ;;  %v2553_v24 = vmov 5  }
 0x602   :  { %2478 = vset.pattern.permute.xlu1 %v2553_v24  ;;  %2477 = vset.pattern.permute.xlu2 %v2553_v24 }
 0x603   :  { %v1321_v30 = vadd.f32 %v1297_v27, %v1270_v26  ;;  %1615 = vperm.xlu1 %2478, %v2818_v50   ;;  %1611 = vperm.xlu2 %2477, %v2821_v51   ;;  %v1496_v26 = vld [vmem:[#allocation4 + $0x330] sm:$0xff] }
 0x604   :  { %2479 = vset.pattern.permute.xlu0 %v2553_v24 }
 0x605   :  { %v1329_v32 = vmax.f32 %v1321_v30, 0.0  ;;  %v1240_v42 = vpop.f32.mrf.mxu1  ;;  %v2885_v30 = vld [vmem:[#allocation4 + $0x4a8] sm:$0xff] }
 0x607   :  { %2368 = vmatmul.msk.f32.gmra.mxu3 %vm47_vm0, %v1329_v32  ;;  %2376 = vmatmul.msk.f32.gmra.mxu0 %vm47_vm0, %v1329_v32 }
 0x608   :  { %2384 = vmatmul.msk.f32.gmra.mxu1 %vm47_vm0, %v1329_v32  ;;  %v1272_v33 = vpop.f32.mrf.mxu2  ;;  %v2888_v32 = vld [vmem:[#allocation4 + $0x4b0] sm:$0xff] }
 0x609   :  { %v1273_v35 = vadd.f32 %v1272_v33, %v1231_v25  ;;  %v1701_v25 = vld [vmem:[#allocation4 + $0x490] sm:$0xff]  ;;  %v2891_v33 = vld [vmem:[#allocation4 + $0x4a0] sm:$0xff] }
 0x60a   :  { %1703 = vrot.lane.b32.xlu0 %v1701_v25, %s2554_s0 }
 0x60b   :  { %v1322_v59 = vadd.f32 %v1301_v36, %v1273_v35  ;;  %1627 = vperm.xlu1 %2478, %v2888_v32   ;;  %1619 = vperm.xlu2 %2477, %v2891_v33   ;;  %v2895_v35 = vld [vmem:[#allocation4 + $0x4c0] sm:$0xff]  ;;  %v1488_v36 = vld [vmem:[#allocation4 + $0x2f0] sm:$0xff] }
 0x60d   :  { %v1330_v38 = vmax.f32 %v1322_v59, 0.0  ;;  %v1243_v61 = vpop.f32.mrf.mxu1  ;;  %v1498_v59 = vld [vmem:[#allocation4 + $0x340] sm:$0xff] }
 0x60f   :  { %2369 = vmatmul.msk.f32.gmra.mxu3 %vm47_vm0, %v1330_v38  ;;  %2377 = vmatmul.msk.f32.gmra.mxu0 %vm47_vm0, %v1330_v38 }
 0x610   :  { %2385 = vmatmul.msk.f32.gmra.mxu1 %vm47_vm0, %v1330_v38  ;;  %v1275_v39 = vpop.f32.mrf.mxu2  ;;  %v1489_v38 = vld [vmem:[#allocation4 + $0x2f8] sm:$0xff] }
 0x611   :  { %v1276_v47 = vadd.f32 %v1275_v39, %v1234_v34  ;;  %v1497_v34 = vld [vmem:[#allocation4 + $0x338] sm:$0xff]  ;;  %v1499_v39 = vld [vmem:[#allocation4 + $0x348] sm:$0xff] }
 0x612   :  { %1623 = vperm.xlu0 %2479, %v2885_v30  }
 0x613   :  { %v1323_v49 = vadd.f32 %v1305_v63, %v1276_v47  ;;  %1635 = vperm.xlu1 %2478, %v2895_v35   ;;  %1631 = vperm.xlu2 %2477, %v2833_v55   ;;  %v1491_v47 = vld [vmem:[#allocation4 + $0x308] sm:$0xff]  ;;  %v1501_v63 = vld [vmem:[#allocation4 + $0x358] sm:$0xff] }
 0x615   :  { %v1331_v3 = vmax.f32 %v1323_v49, 0.0  ;;  %v1502_v49 = vld [vmem:[#allocation4 + $0x360] sm:$0xff] }
 0x617   :  { %2370 = vmatmul.msk.f32.gmra.mxu3 %vm47_vm0, %v1331_v3  ;;  %2378 = vmatmul.msk.f32.gmra.mxu0 %vm47_vm0, %v1331_v3 }
 0x618   :  { %2386 = vmatmul.msk.f32.gmra.mxu1 %vm47_vm0, %v1331_v3  ;;  %v1278_v40 = vpop.f32.mrf.mxu2  ;;  %v1493_v3 = vld [vmem:[#allocation4 + $0x318] sm:$0xff] }
 0x619   :  { %v1279_v53 = vadd.f32 %v1278_v40, %v1237_v48  ;;  %v1492_v48 = vld [vmem:[#allocation4 + $0x310] sm:$0xff]  ;;  %v1503_v40 = vld [vmem:[#allocation4 + $0x368] sm:$0xff] }
 0x61a   :  { %1794 = vrot.lane.b32.xlu0 %v2829_v54, %s2555_s1 }
 0x61b   :  { %v1324_v45 = vadd.f32 %v1309_v43, %v1279_v53  ;;  %1639 = vperm.xlu2 %2477, %v2829_v54   ;;  %v1494_v53 = vld [vmem:[#allocation4 + $0x320] sm:$0xff]  ;;  %v1495_v43 = vld [vmem:[#allocation4 + $0x328] sm:$0xff]  ;;  %1792 = vrot.lane.b32.xlu1 %v2895_v35, %s2555_s1 }
 0x61d   :  { %v1332_v56 = vmax.f32 %v1324_v45, 0.0 }
 0x61f   :  { %2371 = vmatmul.msk.f32.gmra.mxu3 %vm47_vm0, %v1332_v56  ;;  %2379 = vmatmul.msk.f32.gmra.mxu0 %vm47_vm0, %v1332_v56 }
 0x620   :  { %2387 = vmatmul.msk.f32.gmra.mxu1 %vm47_vm0, %v1332_v56  ;;  %v1281_v57 = vpop.f32.mrf.mxu2 }
 0x621   :  { %v1282_v7 = vadd.f32 %v1281_v57, %v1240_v42 }
 0x622   :  { %1788 = vrot.lane.b32.xlu0 %v2888_v32, %s2555_s1 }
 0x623   :  { %v1325_v58 = vadd.f32 %v1313_v22, %v1282_v7  ;;  %1790 = vrot.lane.b32.xlu2 %v2833_v55, %s2555_s1  ;;  %1786 = vrot.lane.b32.xlu1 %v2885_v30, %s2555_s1 }
 0x625   :  { %v1333_v60 = vmax.f32 %v1325_v58, 0.0 }
 0x627   :  { %2372 = vmatmul.msk.f32.gmra.mxu3 %vm47_vm0, %v1333_v60  ;;  %2380 = vmatmul.msk.f32.gmra.mxu0 %vm47_vm0, %v1333_v60 }
 0x628   :  { %2388 = vmatmul.msk.f32.gmra.mxu1 %vm47_vm0, %v1333_v60  ;;  %v1284_v62 = vpop.f32.mrf.mxu2 }
 0x629   :  { %v1285_v11 = vadd.f32 %v1284_v62, %v1243_v61 }
 0x62a   :  { %1782 = vrot.lane.b32.xlu0 %v2818_v50, %s2555_s1 }
 0x62b   :  { %v1326_v28 = vadd.f32 %v1317_v0, %v1285_v11  ;;  %1784 = vrot.lane.b32.xlu2 %v2891_v33, %s2555_s1  ;;  %1780 = vrot.lane.b32.xlu1 %v2821_v51, %s2555_s1 }
 0x62d   :  { %v1334_v1 = vmax.f32 %v1326_v28, 0.0 }
 0x62f   :  { %2373 = vmatmul.msk.f32.gmra.mxu3 %vm47_vm0, %v1334_v1  ;;  %2381 = vmatmul.msk.f32.gmra.mxu0 %vm47_vm0, %v1334_v1 }
 0x630   :  { %2389 = vmatmul.msk.f32.gmra.mxu1 %vm47_vm0, %v1334_v1 }
 0x632   :  { %1897 = vrot.lane.b32.xlu0 %v2895_v35, %s2556_s21 }
 0x633   :  { %1895 = vrot.lane.b32.xlu1 %v2833_v55, %s2556_s21  ;;  %1899 = vrot.lane.b32.xlu2 %v2829_v54, %s2556_s21 }
 0x637   :  { %2398 = vmatmul.msk.f32.vlgmr.msrb.gmra.mxu0 %vm47_vm0, %v2742_v29 }
 0x63a   :  { %1891 = vrot.lane.b32.xlu0 %v2885_v30, %s2556_s21 }
 0x63b   :  { %1889 = vrot.lane.b32.xlu1 %v2891_v33, %s2556_s21  ;;  %1893 = vrot.lane.b32.xlu2 %v2888_v32, %s2556_s21 }
 0x63f   :  { %2399 = vmatmul.msk.f32.gmra.mxu0 %vm47_vm0, %v2751_v37 }
 0x642   :  { %1885 = vrot.lane.b32.xlu0 %v2821_v51, %s2556_s21 }
 0x643   :  { %1887 = vrot.lane.b32.xlu2 %v2818_v50, %s2556_s21  ;;  %2012 = vrot.lane.b32.xlu1 %v2829_v54, %s2557_s22 }
 0x647   :  { %2400 = vmatmul.msk.f32.gmra.mxu0 %vm47_vm0, %v2760_v46 }
 0x64a   :  { %2008 = vrot.lane.b32.xlu0 %v2833_v55, %s2557_s22 }
 0x64b   :  { %2010 = vrot.lane.b32.xlu2 %v2895_v35, %s2557_s22  ;;  %2006 = vrot.lane.b32.xlu1 %v2888_v32, %s2557_s22 }
 0x64f   :  { %2401 = vmatmul.msk.f32.gmra.mxu0 %vm47_vm0, %v2769_v52 }
 0x652   :  { %2002 = vrot.lane.b32.xlu0 %v2891_v33, %s2557_s22 }
 0x653   :  { %2004 = vrot.lane.b32.xlu2 %v2885_v30, %s2557_s22  ;;  %2000 = vrot.lane.b32.xlu1 %v2818_v50, %s2557_s22 }
 0x657   :  { %2402 = vmatmul.msk.f32.gmra.mxu0 %vm47_vm0, %v2778_v20 }
 0x65a   :  { %2117 = vrot.lane.b32.xlu0 %v2829_v54, %s2558_s23 }
 0x65b   :  { %1998 = vrot.lane.b32.xlu2 %v2821_v51, %s2557_s22  ;;  %2115 = vrot.lane.b32.xlu1 %v2895_v35, %s2558_s23 }
 0x65d   :  { %v1612_v60 = vpop.permute.xlu2 %1611 }
 0x65f   :  { %2403 = vmatmul.msk.f32.gmra.mxu0 %vm47_vm0, %v2787_v31 }
 0x662   :  { %2111 = vrot.lane.b32.xlu0 %v2888_v32, %s2558_s23 }
 0x663   :  { %2113 = vrot.lane.b32.xlu2 %v2833_v55, %s2558_s23  ;;  %2109 = vrot.lane.b32.xlu1 %v2885_v30, %s2558_s23 }
 0x667   :  { %2404 = vmatmul.msk.f32.gmra.mxu0 %vm47_vm0, %v2796_v5 }
 0x66a   :  { %2105 = vrot.lane.b32.xlu0 %v2818_v50, %s2558_s23 }
 0x66b   :  { %2107 = vrot.lane.b32.xlu2 %v2891_v33, %s2558_s23  ;;  %2103 = vrot.lane.b32.xlu1 %v2821_v51, %s2558_s23 }
 0x66f   :  { %2405 = vmatmul.msk.f32.gmra.mxu0 %vm47_vm0, %v2805_v12 }
 0x674   :  { %v1421_v29 = vpop.f32.mrf.mxu0 }
 0x675   :  { %v1464_v37 = vpop.f32.mrf.mxu1 }
 0x67a   :  { %v2880_v2 = vpop.f32.mrf.mxu3 }
 0x67c   :  { %v1424_v46 = vpop.f32.mrf.mxu0  ;;  %v1704_v45 = vpop.permute.xlu0 %1703 }
 0x67d   :  { %v1467_v4 = vpop.f32.mrf.mxu1  ;;  %1746 = vmatpush.msra.mxu1 %v1704_v45 }
 0x682   :  { %v1381_v15 = vpop.f32.mrf.mxu3 }
 0x684   :  { %v1427_v52 = vpop.f32.mrf.mxu0 }
 0x685   :  { %v1470_v6 = vpop.f32.mrf.mxu1 }
 0x68a   :  { %v1384_v8 = vpop.f32.mrf.mxu3 }
 0x68c   :  { %v1430_v20 = vpop.f32.mrf.mxu0 }
 0x68d   :  { %v1473_v9 = vpop.f32.mrf.mxu1 }
 0x692   :  { %v1387_v10 = vpop.f32.mrf.mxu3 }
 0x694   :  { %v1433_v31 = vpop.f32.mrf.mxu0 }
 0x695   :  { %v1476_v19 = vpop.f32.mrf.mxu1 }
 0x69a   :  { %v1390_v14 = vpop.f32.mrf.mxu3 }
 0x69c   :  { %v1436_v13 = vpop.f32.mrf.mxu0 }
 0x69d   :  { %v1479_v5 = vpop.f32.mrf.mxu1 }
 0x6a2   :  { %v1393_v17 = vpop.f32.mrf.mxu3 }
 0x6a4   :  { %v1439_v16 = vpop.f32.mrf.mxu0 }
 0x6a5   :  { %v1482_v12 = vpop.f32.mrf.mxu1 }
 0x6aa   :  { %v1396_v23 = vpop.f32.mrf.mxu3 }
 0x6ac   :  { %v1442_v18 = vpop.f32.mrf.mxu0 }
 0x6ad   :  { %v1485_v21 = vpop.f32.mrf.mxu1  ;;  %1569 = vmatpush.msra.mxu3 %v1442_v18 }
 0x6ae   :  { %1536 = vmatpush.msrb.mxu2 %v1485_v21 }
 0x6af   :  { %1570 = vmatpush.msra.mxu3 %v1439_v16 }
 0x6b0   :  { %1537 = vmatpush.msrb.mxu2 %v1482_v12 }
 0x6b1   :  { %1571 = vmatpush.msra.mxu3 %v1436_v13 }
 0x6b2   :  { %1538 = vmatpush.msrb.mxu2 %v1479_v5  ;;  %v1399_v27 = vpop.f32.mrf.mxu3 }
 0x6b3   :  { %1572 = vmatpush.msra.mxu3 %v1433_v31 }
 0x6b4   :  { %1539 = vmatpush.msrb.mxu2 %v1476_v19  ;;  %v1677_v56 = vpop.f32.mrf.mxu0  ;;  %v1624_v19 = vpop.permute.xlu0 %1623 }
 0x6b5   :  { %1573 = vmatpush.msra.mxu3 %v1430_v20 }
 0x6b6   :  { %1540 = vmatpush.msrb.mxu2 %v1473_v9 }
 0x6b7   :  { %1574 = vmatpush.msra.mxu3 %v1427_v52 }
 0x6b8   :  { %1541 = vmatpush.msrb.mxu2 %v1470_v6 }
 0x6b9   :  { %1575 = vmatpush.msra.mxu3 %v1424_v46 }
 0x6ba   :  { %1542 = vmatpush.msrb.mxu2 %v1467_v4 }
 0x6bb   :  { %1576 = vmatpush.msra.mxu3 %v1421_v29  ;;  %v1616_v29 = vpop.permute.xlu1 %1615 }
 0x6bc   :  { %1543 = vmatpush.msrb.mxu2 %v1464_v37  ;;  %v1680_v58 = vpop.f32.mrf.mxu0 }
 0x6bd   :  { %1577 = vmatpush.msra.mxu3 %v1399_v27  ;;  %2390 = vmatmul.msk.f32.vlgmr.msrb.gmra.mxu2 %vm526_vm3, %v1496_v26 }
 0x6bf   :  { %1578 = vmatpush.msra.mxu3 %v1396_v23 }
 0x6c1   :  { %1579 = vmatpush.msra.mxu3 %v1393_v17 }
 0x6c3   :  { %1580 = vmatpush.msra.mxu3 %v1390_v14  ;;  %v1628_v25 = vpop.permute.xlu1 %1627 }
 0x6c5   :  { %1581 = vmatpush.msra.mxu3 %v1387_v10  ;;  %2391 = vmatmul.msk.f32.gmra.mxu2 %vm526_vm3, %v1497_v34 }
 0x6c7   :  { %1582 = vmatpush.msra.mxu3 %v1384_v8  ;;  %v1620_v8 = vpop.permute.xlu2 %1619 }
 0x6c9   :  { %1583 = vmatpush.msra.mxu3 %v1381_v15 }
 0x6cb   :  { %1584 = vmatpush.msra.mxu3 %v2880_v2  ;;  %v1683_v2 = vpop.f32.mrf.mxu0 }
 0x6cc   :  { %1585 = vmatmul.f32.vlgmr.msra.gmra.mxu3 %v1488_v36 }
 0x6cd   :  { %2392 = vmatmul.msk.f32.gmra.mxu2 %vm526_vm3, %v1498_v59 }
 0x6d3   :  { %v1686_v10 = vpop.f32.mrf.mxu0 }
 0x6d4   :  { %1588 = vmatmul.f32.gmra.mxu3 %v1489_v38 }
 0x6d5   :  { %2393 = vmatmul.msk.f32.gmra.mxu2 %vm526_vm3, %v1499_v39  ;;  %v1632_v39 = vpop.permute.xlu2 %1631 }
 0x6db   :  { %v1689_v18 = vpop.f32.mrf.mxu0 }
 0x6dc   :  { %1591 = vmatmul.f32.gmra.mxu3 %v1490_v41 }
 0x6dd   :  { %2394 = vmatmul.msk.f32.gmra.mxu2 %vm526_vm3, %v1500_v44 }
 0x6e3   :  { %v1692_v38 = vpop.f32.mrf.mxu0 }
 0x6e4   :  { %1594 = vmatmul.f32.gmra.mxu3 %v1491_v47 }
 0x6e5   :  { %2395 = vmatmul.msk.f32.gmra.mxu2 %vm526_vm3, %v1501_v63 }
 0x6ec   :  { %1597 = vmatmul.f32.gmra.mxu3 %v1492_v48 }
 0x6ed   :  { %2396 = vmatmul.msk.f32.gmra.mxu2 %vm526_vm3, %v1502_v49 }
 0x6f4   :  { %1600 = vmatmul.f32.gmra.mxu3 %v1493_v3  ;;  %v1636_v3 = vpop.permute.xlu1 %1635 }
 0x6f5   :  { %2397 = vmatmul.msk.f32.gmra.mxu2 %vm526_vm3, %v1503_v40 }
 0x6fc   :  { %1603 = vmatmul.f32.gmra.mxu3 %v1494_v53  ;;  %v1695_v53 = vpop.f32.mrf.mxu0 }
 0x704   :  { %1606 = vmatmul.f32.gmra.mxu3 %v1495_v43 }
 0x740   :  { %v1545_v42 = vpop.f32.mrf.mxu2 }
 0x748   :  { %v1548_v57 = vpop.f32.mrf.mxu2 }
 0x74f   :  { %v1586_v7 = vpop.f32.mrf.mxu3 }
 0x750   :  { %v1587_v22 = vadd.f32 %v1586_v7, %v1545_v42  ;;  %v1551_v62 = vpop.f32.mrf.mxu2  ;;  %v1640_v7 = vpop.permute.xlu2 %1639 }
 0x752   :  { %v1642_v61 = vadd.f32 %v1612_v60, %v1587_v22  ;;  %v1698_v60 = vpop.f32.mrf.mxu0 }
 0x754   :  { %v1650_v11 = vmax.f32 %v1642_v61, 0.0 }
 0x756   :  { %v1678_v0 = vadd.f32 %v1677_v56, %v1650_v11 }
 0x757   :  { %v1589_v28 = vpop.f32.mrf.mxu3 }
 0x758   :  { %v1590_v1 = vadd.f32 %v1589_v28, %v1548_v57  ;;  %2406 = vmatmul.msk.f32.vlgmr.msra.gmra.mxu1 %vm1706_vm4, %v1678_v0  ;;  %v1554_v4 = vpop.f32.mrf.mxu2 }
 0x75a   :  { %v1643_v37 = vadd.f32 %v1616_v29, %v1590_v1 }
 0x75c   :  { %v1651_v46 = vmax.f32 %v1643_v37, 0.0 }
 0x75e   :  { %v1681_v15 = vadd.f32 %v1680_v58, %v1651_v46  ;;  %v1772_v46 = vld [vmem:[#allocation4 + $0x380] sm:$0xff] }
 0x75f   :  { %v1592_v52 = vpop.f32.mrf.mxu3 }
 0x760   :  { %v1593_v6 = vadd.f32 %v1592_v52, %v1551_v62  ;;  %2407 = vmatmul.msk.f32.gmra.mxu1 %vm1706_vm4, %v1681_v15  ;;  %v1557_v5 = vpop.f32.mrf.mxu2  ;;  %v1774_v15 = vld [vmem:[#allocation4 + $0x390] sm:$0xff]  ;;  %v1775_v52 = vld [vmem:[#allocation4 + $0x398] sm:$0xff] }
 0x762   :  { %v1644_v20 = vadd.f32 %v1620_v8, %v1593_v6  ;;  %v1776_v6 = vld [vmem:[#allocation4 + $0x3a0] sm:$0xff]  ;;  %v1777_v8 = vld [vmem:[#allocation4 + $0x3a8] sm:$0xff] }
 0x764   :  { %v1652_v9 = vmax.f32 %v1644_v20, 0.0  ;;  %v1778_v20 = vld [vmem:[#allocation4 + $0x3b0] sm:$0xff] }
 0x766   :  { %v1684_v31 = vadd.f32 %v1683_v2, %v1652_v9  ;;  %v1779_v9 = vld [vmem:[#allocation4 + $0x3b8] sm:$0xff] }
 0x767   :  { %v1595_v13 = vpop.f32.mrf.mxu3 }
 0x768   :  { %v1596_v14 = vadd.f32 %v1595_v13, %v1554_v4  ;;  %2408 = vmatmul.msk.f32.gmra.mxu1 %vm1706_vm4, %v1684_v31  ;;  %v1560_v24 = vpop.f32.mrf.mxu2  ;;  %v1773_v4 = vld [vmem:[#allocation4 + $0x388] sm:$0xff] }
 0x76a   :  { %v1645_v16 = vadd.f32 %v1624_v19, %v1596_v14 }
 0x76c   :  { %v1653_v12 = vmax.f32 %v1645_v16, 0.0  ;;  %v1795_v16 = vpop.permute.xlu0 %1794 }
 0x76e   :  { %v1687_v17 = vadd.f32 %v1686_v10, %v1653_v12  ;;  %v1793_v12 = vpop.permute.xlu1 %1792 }
 0x76f   :  { %v1598_v21 = vpop.f32.mrf.mxu3 }
 0x770   :  { %v1599_v23 = vadd.f32 %v1598_v21, %v1557_v5  ;;  %2409 = vmatmul.msk.f32.gmra.mxu1 %vm1706_vm4, %v1687_v17  ;;  %v1563_v44 = vpop.f32.mrf.mxu2 }
 0x772   :  { %v1646_v26 = vadd.f32 %v1628_v25, %v1599_v23 }
 0x774   :  { %v1654_v27 = vmax.f32 %v1646_v26, 0.0  ;;  %v1789_v21 = vpop.permute.xlu0 %1788 }
 0x776   :  { %v1690_v34 = vadd.f32 %v1689_v18, %v1654_v27  ;;  %v1791_v18 = vpop.permute.xlu2 %1790  ;;  %v1787_v23 = vpop.permute.xlu1 %1786 }
 0x777   :  { %v1601_v36 = vpop.f32.mrf.mxu3 }
 0x778   :  { %v1602_v59 = vadd.f32 %v1601_v36, %v1560_v24  ;;  %2410 = vmatmul.msk.f32.gmra.mxu1 %vm1706_vm4, %v1690_v34  ;;  %v1566_v45 = vpop.f32.mrf.mxu2 }
 0x77a   :  { %v1647_v41 = vadd.f32 %v1632_v39, %v1602_v59 }
 0x77c   :  { %v1655_v47 = vmax.f32 %v1647_v41, 0.0 }
 0x77e   :  { %v1693_v63 = vadd.f32 %v1692_v38, %v1655_v47  ;;  %v1785_v38 = vpop.permute.xlu2 %1784 }
 0x77f   :  { %v1604_v48 = vpop.f32.mrf.mxu3 }
 0x780   :  { %v1605_v49 = vadd.f32 %v1604_v48, %v1563_v44  ;;  %2411 = vmatmul.msk.f32.gmra.mxu1 %vm1706_vm4, %v1693_v63  ;;  %v1783_v44 = vpop.permute.xlu0 %1782  ;;  %v1781_v48 = vpop.permute.xlu1 %1780 }
 0x782   :  { %v1648_v40 = vadd.f32 %v1636_v3, %v1605_v49 }
 0x784   :  { %v1656_v43 = vmax.f32 %v1648_v40, 0.0 }
 0x786   :  { %v1696_v42 = vadd.f32 %v1695_v53, %v1656_v43 }
 0x787   :  { %v1607_v56 = vpop.f32.mrf.mxu3 }
 0x788   :  { %v1608_v57 = vadd.f32 %v1607_v56, %v1566_v45  ;;  %2412 = vmatmul.msk.f32.gmra.mxu1 %vm1706_vm4, %v1696_v42  ;;  %v1877_v42 = vld [vmem:[#allocation4 + $0x3c0] sm:$0xff]  ;;  %v1878_v56 = vld [vmem:[#allocation4 + $0x3c8] sm:$0xff] }
 0x78a   :  { %v1649_v22 = vadd.f32 %v1640_v7, %v1608_v57  ;;  %v1879_v57 = vld [vmem:[#allocation4 + $0x3d0] sm:$0xff]  ;;  %v1880_v7 = vld [vmem:[#allocation4 + $0x3d8] sm:$0xff] }
 0x78c   :  { %v1657_v58 = vmax.f32 %v1649_v22, 0.0  ;;  %v1881_v22 = vld [vmem:[#allocation4 + $0x3e0] sm:$0xff] }
 0x78e   :  { %v1699_v61 = vadd.f32 %v1698_v60, %v1657_v58  ;;  %v1882_v58 = vld [vmem:[#allocation4 + $0x3e8] sm:$0xff]  ;;  %v1883_v60 = vld [vmem:[#allocation4 + $0x3f0] sm:$0xff] }
 0x790   :  { %2413 = vmatmul.msk.f32.gmra.mxu1 %vm1706_vm4, %v1699_v61  ;;  %v1884_v61 = vld [vmem:[#allocation4 + $0x3f8] sm:$0xff] }
 0x7d5   :  { %v2923_v62 = vpop.f32.mrf.mxu1 }
 0x7dd   :  { %v2925_v11 = vpop.f32.mrf.mxu1 }
 0x7e5   :  { %v2927_v0 = vpop.f32.mrf.mxu1 }
 0x7ed   :  { %v2929_v28 = vpop.f32.mrf.mxu1 }
 0x7f5   :  { %v2931_v1 = vpop.f32.mrf.mxu1 }
 0x7fd   :  { %v2933_v29 = vpop.f32.mrf.mxu1 }
 0x805   :  { %v2935_v37 = vpop.f32.mrf.mxu1 }
 0x80d   :  { %v2937_v2 = vpop.f32.mrf.mxu1 }
 0x80e   :  { %1836 = vmatpush.msra.mxu2 %v2937_v2 }
 0x810   :  { %1837 = vmatpush.msra.mxu2 %v2935_v37 }
 0x812   :  { %1838 = vmatpush.msra.mxu2 %v2933_v29 }
 0x814   :  { %1839 = vmatpush.msra.mxu2 %v2931_v1 }
 0x816   :  { %1840 = vmatpush.msra.mxu2 %v2929_v28 }
 0x818   :  { %1841 = vmatpush.msra.mxu2 %v2927_v0 }
 0x81a   :  { %1842 = vmatpush.msra.mxu2 %v2925_v11 }
 0x81c   :  { %1843 = vmatpush.msra.mxu2 %v2923_v62 }
 0x81d   :  { %2414 = vmatmul.msk.f32.vlgmr.msra.gmra.mxu2 %vm526_vm3, %v1772_v46 }
 0x825   :  { %2415 = vmatmul.msk.f32.gmra.mxu2 %vm526_vm3, %v1773_v4 }
 0x82d   :  { %2416 = vmatmul.msk.f32.gmra.mxu2 %vm526_vm3, %v1774_v15 }
 0x835   :  { %2417 = vmatmul.msk.f32.gmra.mxu2 %vm526_vm3, %v1775_v52 }
 0x83d   :  { %2418 = vmatmul.msk.f32.gmra.mxu2 %vm526_vm3, %v1776_v6 }
 0x845   :  { %2419 = vmatmul.msk.f32.gmra.mxu2 %vm526_vm3, %v1777_v8 }
 0x84d   :  { %2420 = vmatmul.msk.f32.gmra.mxu2 %vm526_vm3, %v1778_v20  ;;  %v1900_v20 = vpop.permute.xlu2 %1899 }
 0x855   :  { %2421 = vmatmul.msk.f32.gmra.mxu2 %vm526_vm3, %v1779_v9  ;;  %v1898_v9 = vpop.permute.xlu0 %1897 }
 0x8a0   :  { %v1845_v10 = vpop.f32.mrf.mxu2 }
 0x8a1   :  { %v1846_v40 = vadd.f32 %v1845_v10, %v1781_v48 }
 0x8a3   :  { %v1869_v45 = vmax.f32 %v1846_v40, 0.0  ;;  %v1991_v40 = vld [vmem:[#allocation4 + $0x408] sm:$0xff] }
 0x8a8   :  { %v1848_v31 = vpop.f32.mrf.mxu2 }
 0x8a9   :  { %v1849_v49 = vadd.f32 %v1848_v31, %v1783_v44  ;;  %v1896_v31 = vpop.permute.xlu1 %1895 }
 0x8ab   :  { %v1870_v43 = vmax.f32 %v1849_v49, 0.0 }
 0x8b0   :  { %v1851_v19 = vpop.f32.mrf.mxu2 }
 0x8b1   :  { %v1852_v47 = vadd.f32 %v1851_v19, %v1785_v38  ;;  %v1894_v19 = vpop.permute.xlu2 %1893 }
 0x8b3   :  { %v1871_v53 = vmax.f32 %v1852_v47, 0.0 }
 0x8b8   :  { %v1854_v13 = vpop.f32.mrf.mxu2 }
 0x8b9   :  { %v1855_v39 = vadd.f32 %v1854_v13, %v1787_v23  ;;  %v1892_v13 = vpop.permute.xlu0 %1891  ;;  %v1890_v23 = vpop.permute.xlu1 %1889 }
 0x8bb   :  { %v1872_v3 = vmax.f32 %v1855_v39, 0.0 }
 0x8c0   :  { %v1857_v5 = vpop.f32.mrf.mxu2 }
 0x8c1   :  { %v1858_v36 = vadd.f32 %v1857_v5, %v1789_v21  ;;  %v1886_v38 = vpop.permute.xlu0 %1885 }
 0x8c3   :  { %v1873_v63 = vmax.f32 %v1858_v36, 0.0 }
 0x8c8   :  { %v1860_v14 = vpop.f32.mrf.mxu2 }
 0x8c9   :  { %v1861_v27 = vadd.f32 %v1860_v14, %v1791_v18  ;;  %v2009_v55 = vpop.permute.xlu0 %2008 }
 0x8cb   :  { %v1874_v41 = vmax.f32 %v1861_v27, 0.0  ;;  %v1888_v27 = vpop.permute.xlu2 %1887 }
 0x8d0   :  { %v1863_v17 = vpop.f32.mrf.mxu2 }
 0x8d1   :  { %v1864_v24 = vadd.f32 %v1863_v17, %v1793_v12  ;;  %v2003_v50 = vpop.permute.xlu0 %2002 }
 0x8d3   :  { %v1875_v59 = vmax.f32 %v1864_v24, 0.0  ;;  %v2011_v54 = vpop.permute.xlu2 %2010 }
 0x8d8   :  { %v1866_v25 = vpop.f32.mrf.mxu2 }
 0x8d9   :  { %v1867_v26 = vadd.f32 %v1866_v25, %v1795_v16 }
 0x8db   :  { %v1876_v34 = vmax.f32 %v1867_v26, 0.0  ;;  %v2005_v30 = vpop.permute.xlu2 %2004 }
 0x8dd   :  { %1941 = vmatpush.msrb.mxu3 %v1876_v34 }
 0x8df   :  { %1942 = vmatpush.msrb.mxu3 %v1875_v59 }
 0x8e1   :  { %1943 = vmatpush.msrb.mxu3 %v1874_v41 }
 0x8e3   :  { %1944 = vmatpush.msrb.mxu3 %v1873_v63 }
 0x8e5   :  { %1945 = vmatpush.msrb.mxu3 %v1872_v3 }
 0x8e7   :  { %1946 = vmatpush.msrb.mxu3 %v1871_v53  ;;  %v1994_v53 = vld [vmem:[#allocation4 + $0x420] sm:$0xff] }
 0x8e9   :  { %1947 = vmatpush.msrb.mxu3 %v1870_v43  ;;  %v1996_v43 = vld [vmem:[#allocation4 + $0x430] sm:$0xff] }
 0x8eb   :  { %1948 = vmatpush.msrb.mxu3 %v1869_v45  ;;  %v1997_v45 = vld [vmem:[#allocation4 + $0x438] sm:$0xff] }
 0x8ec   :  { %2422 = vmatmul.msk.f32.vlgmr.msrb.gmra.mxu3 %vm526_vm3, %v1877_v42 }
 0x8f4   :  { %2423 = vmatmul.msk.f32.gmra.mxu3 %vm526_vm3, %v1878_v56 }
 0x8fc   :  { %2424 = vmatmul.msk.f32.gmra.mxu3 %vm526_vm3, %v1879_v57 }
 0x904   :  { %2425 = vmatmul.msk.f32.gmra.mxu3 %vm526_vm3, %v1880_v7 }
 0x90c   :  { %2426 = vmatmul.msk.f32.gmra.mxu3 %vm526_vm3, %v1881_v22 }
 0x914   :  { %2427 = vmatmul.msk.f32.gmra.mxu3 %vm526_vm3, %v1882_v58  ;;  %v2013_v58 = vpop.permute.xlu1 %2012 }
 0x91c   :  { %2428 = vmatmul.msk.f32.gmra.mxu3 %vm526_vm3, %v1883_v60 }
 0x924   :  { %2429 = vmatmul.msk.f32.gmra.mxu3 %vm526_vm3, %v1884_v61  ;;  %v2007_v61 = vpop.permute.xlu1 %2006 }
 0x96f   :  { %v1950_v46 = vpop.f32.mrf.mxu3 }
 0x970   :  { %v1951_v47 = vadd.f32 %v1950_v46, %v1886_v38  ;;  %v2491_v38 = vld [vmem:[#allocation4 + $0x490] sm:$0xff] }
 0x971   :  { %2210 = vrot.lane.b32.xlu2 %v2491_v38, %s2559_s24 }
 0x972   :  { %v1974_v49 = vmax.f32 %v1951_v47, 0.0 }
 0x977   :  { %v1953_v4 = vpop.f32.mrf.mxu3 }
 0x978   :  { %v1954_v39 = vadd.f32 %v1953_v4, %v1888_v27  ;;  %v2101_v27 = vld [vmem:[#allocation4 + $0x470] sm:$0xff] }
 0x97a   :  { %v1975_v48 = vmax.f32 %v1954_v39, 0.0 }
 0x97f   :  { %v1956_v15 = vpop.f32.mrf.mxu3 }
 0x980   :  { %v1957_v34 = vadd.f32 %v1956_v15, %v1890_v23  ;;  %v2098_v23 = vld [vmem:[#allocation4 + $0x458] sm:$0xff] }
 0x982   :  { %v1976_v63 = vmax.f32 %v1957_v34, 0.0  ;;  %v2102_v34 = vld [vmem:[#allocation4 + $0x478] sm:$0xff] }
 0x984   :  { %v2999_v3 = vadd.f32 %v1976_v63, %v2927_v0  ;;  %v1992_v0 = vld [vmem:[#allocation4 + $0x410] sm:$0xff] }
 0x987   :  { %v1959_v52 = vpop.f32.mrf.mxu3 }
 0x988   :  { %v1960_v25 = vadd.f32 %v1959_v52, %v1892_v13 }
 0x98a   :  { %v1977_v41 = vmax.f32 %v1960_v25, 0.0  ;;  %v2099_v25 = vld [vmem:[#allocation4 + $0x460] sm:$0xff] }
 0x98f   :  { %v1962_v6 = vpop.f32.mrf.mxu3 }
 0x990   :  { %v1963_v17 = vadd.f32 %v1962_v6, %v1894_v19 }
 0x992   :  { %v1978_v36 = vmax.f32 %v1963_v17, 0.0  ;;  %v2095_v17 = vld [vmem:[#allocation4 + $0x440] sm:$0xff] }
 0x997   :  { %v1965_v8 = vpop.f32.mrf.mxu3 }
 0x998   :  { %v1966_v16 = vadd.f32 %v1965_v8, %v1896_v31  ;;  %v1999_v31 = vpop.permute.xlu2 %1998 }
 0x99a   :  { %v1979_v24 = vmax.f32 %v1966_v16, 0.0 }
 0x99c   :  { %v2987_v44 = vadd.f32 %v1979_v24, %v2933_v29  ;;  %v3003_v29 = vadd.f32 %v1975_v48, %v2925_v11  ;;  %v1993_v11 = vld [vmem:[#allocation4 + $0x418] sm:$0xff]  ;;  %v2100_v24 = vld [vmem:[#allocation4 + $0x468] sm:$0xff] }
 0x99f   :  { %v1968_v10 = vpop.f32.mrf.mxu3 }
 0x9a0   :  { %v1969_v5 = vadd.f32 %v1968_v10, %v1898_v9 }
 0x9a2   :  { %v1980_v18 = vmax.f32 %v1969_v5, 0.0 }
 0x9a4   :  { %v2983_v59 = vadd.f32 %v1980_v18, %v2935_v37  ;;  %v2995_v37 = vadd.f32 %v1977_v41, %v2929_v28  ;;  %v1990_v28 = vld [vmem:[#allocation4 + $0x400] sm:$0xff]  ;;  %v2096_v18 = vld [vmem:[#allocation4 + $0x448] sm:$0xff] }
 0x9a7   :  { %v1971_v14 = vpop.f32.mrf.mxu3 }
 0x9a8   :  { %v1972_v12 = vadd.f32 %v1971_v14, %v1900_v20  ;;  %v2001_v20 = vpop.permute.xlu1 %2000 }
 0x9aa   :  { %v1981_v21 = vmax.f32 %v1972_v12, 0.0 }
 0x9ac   :  { %v2980_v26 = vadd.f32 %v1981_v21, %v2937_v2  ;;  %v2991_v2 = vadd.f32 %v1978_v36, %v2931_v1  ;;  %v3007_v1 = vadd.f32 %v1974_v49, %v2923_v62  ;;  %v1995_v62 = vld [vmem:[#allocation4 + $0x428] sm:$0xff]  ;;  %v2097_v21 = vld [vmem:[#allocation4 + $0x450] sm:$0xff]  ;;  %v2490_v36 = vld [vmem:[#allocation4 + $0x498] sm:$0xff] }
 0x9ad   :  { %2212 = vrot.lane.b32.xlu0 %v2490_v36, %s2559_s24 }
 0x9ae   :  { %2054 = vmatpush.msra.mxu0 %v2980_v26 }
 0x9b0   :  { %2055 = vmatpush.msra.mxu0 %v2983_v59 }
 0x9b2   :  { %2056 = vmatpush.msra.mxu0 %v2987_v44 }
 0x9b4   :  { %2057 = vmatpush.msra.mxu0 %v2991_v2 }
 0x9b6   :  { %2058 = vmatpush.msra.mxu0 %v2995_v37 }
 0x9b8   :  { %2059 = vmatpush.msra.mxu0 %v2999_v3 }
 0x9ba   :  { %2060 = vmatpush.msra.mxu0 %v3003_v29 }
 0x9bc   :  { %2061 = vmatpush.msra.mxu0 %v3007_v1 }
 0x9bd   :  { %2430 = vmatmul.msk.f32.vlgmr.msra.gmra.mxu0 %vm526_vm3, %v1990_v28  ;;  %v2118_v28 = vpop.permute.xlu0 %2117 }
 0x9c5   :  { %2431 = vmatmul.msk.f32.gmra.mxu0 %vm526_vm3, %v1991_v40  ;;  %v2116_v40 = vpop.permute.xlu1 %2115 }
 0x9cd   :  { %2432 = vmatmul.msk.f32.gmra.mxu0 %vm526_vm3, %v1992_v0 }
 0x9d5   :  { %2433 = vmatmul.msk.f32.gmra.mxu0 %vm526_vm3, %v1993_v11  ;;  %v2114_v11 = vpop.permute.xlu2 %2113 }
 0x9dd   :  { %2434 = vmatmul.msk.f32.gmra.mxu0 %vm526_vm3, %v1994_v53  ;;  %v2112_v53 = vpop.permute.xlu0 %2111 }
 0x9e5   :  { %2435 = vmatmul.msk.f32.gmra.mxu0 %vm526_vm3, %v1995_v62  ;;  %v2110_v62 = vpop.permute.xlu1 %2109 }
 0x9ed   :  { %2436 = vmatmul.msk.f32.gmra.mxu0 %vm526_vm3, %v1996_v43 }
 0x9f5   :  { %2437 = vmatmul.msk.f32.gmra.mxu0 %vm526_vm3, %v1997_v45 }
 0xa3a   :  { %v2063_v42 = vpop.f32.mrf.mxu0 }
 0xa3b   :  { %v2064_v5 = vadd.f32 %v2063_v42, %v1999_v31 }
 0xa3d   :  { %v2087_v12 = vmax.f32 %v2064_v5, 0.0 }
 0xa42   :  { %v2066_v56 = vpop.f32.mrf.mxu0 }
 0xa43   :  { %v2067_v19 = vadd.f32 %v2066_v56, %v2001_v20 }
 0xa45   :  { %v2088_v16 = vmax.f32 %v2067_v19, 0.0 }
 0xa4a   :  { %v2069_v57 = vpop.f32.mrf.mxu0 }
 0xa4b   :  { %v2070_v9 = vadd.f32 %v2069_v57, %v2003_v50 }
 0xa4d   :  { %v2089_v14 = vmax.f32 %v2070_v9, 0.0 }
 0xa52   :  { %v2072_v7 = vpop.f32.mrf.mxu0 }
 0xa53   :  { %v2073_v6 = vadd.f32 %v2072_v7, %v2005_v30 }
 0xa55   :  { %v2090_v13 = vmax.f32 %v2073_v6, 0.0 }
 0xa5a   :  { %v2075_v22 = vpop.f32.mrf.mxu0 }
 0xa5b   :  { %v2076_v51 = vadd.f32 %v2075_v22, %v2007_v61 }
 0xa5d   :  { %v2091_v10 = vmax.f32 %v2076_v51, 0.0 }
 0xa62   :  { %v2078_v35 = vpop.f32.mrf.mxu0 }
 0xa63   :  { %v2079_v33 = vadd.f32 %v2078_v35, %v2009_v55  ;;  %v2108_v35 = vpop.permute.xlu2 %2107  ;;  %v2106_v55 = vpop.permute.xlu0 %2105 }
 0xa65   :  { %v2092_v8 = vmax.f32 %v2079_v33, 0.0 }
 0xa6a   :  { %v2081_v60 = vpop.f32.mrf.mxu0 }
 0xa6b   :  { %v2082_v32 = vadd.f32 %v2081_v60, %v2011_v54 }
 0xa6d   :  { %v2093_v52 = vmax.f32 %v2082_v32, 0.0  ;;  %v2104_v32 = vpop.permute.xlu1 %2103 }
 0xa72   :  { %v2084_v46 = vpop.f32.mrf.mxu0 }
 0xa73   :  { %v2085_v4 = vadd.f32 %v2084_v46, %v2013_v58 }
 0xa75   :  { %v2094_v15 = vmax.f32 %v2085_v4, 0.0 }
 0xa77   :  { %2159 = vmatpush.msrb.mxu1 %v2094_v15 }
 0xa79   :  { %2160 = vmatpush.msrb.mxu1 %v2093_v52 }
 0xa7b   :  { %2161 = vmatpush.msrb.mxu1 %v2092_v8 }
 0xa7d   :  { %2162 = vmatpush.msrb.mxu1 %v2091_v10  ;;  %v2211_v10 = vpop.permute.xlu2 %2210 }
 0xa7f   :  { %2163 = vmatpush.msrb.mxu1 %v2090_v13 }
 0xa81   :  { %2164 = vmatpush.msrb.mxu1 %v2089_v14 }
 0xa83   :  { %2165 = vmatpush.msrb.mxu1 %v2088_v16 }
 0xa85   :  { %2166 = vmatpush.msrb.mxu1 %v2087_v12 }
 0xa86   :  { %2438 = vmatmul.msk.f32.vlgmr.msrb.gmra.mxu1 %vm526_vm3, %v2095_v17 }
 0xa8e   :  { %2439 = vmatmul.msk.f32.gmra.mxu1 %vm526_vm3, %v2096_v18 }
 0xa96   :  { %2440 = vmatmul.msk.f32.gmra.mxu1 %vm526_vm3, %v2097_v21 }
 0xa9e   :  { %2441 = vmatmul.msk.f32.gmra.mxu1 %vm526_vm3, %v2098_v23 }
 0xaa6   :  { %2442 = vmatmul.msk.f32.gmra.mxu1 %vm526_vm3, %v2099_v25 }
 0xaae   :  { %2443 = vmatmul.msk.f32.gmra.mxu1 %vm526_vm3, %v2100_v24 }
 0xab6   :  { %2444 = vmatmul.msk.f32.gmra.mxu1 %vm526_vm3, %v2101_v27 }
 0xabe   :  { %2445 = vmatmul.msk.f32.gmra.mxu1 %vm526_vm3, %v2102_v34 }
 0xb03   :  { %v2168_v39 = vpop.f32.mrf.mxu1 }
 0xb04   :  { %v2169_v51 = vadd.f32 %v2168_v39, %v2104_v32 }
 0xb06   :  { %v2192_v8 = vmax.f32 %v2169_v51, 0.0 }
 0xb08   :  { %v2200_v9 = vadd.f32 %v2192_v8, %v3007_v1 }
 0xb0b   :  { %v2171_v41 = vpop.f32.mrf.mxu1 }
 0xb0c   :  { %v2172_v4 = vadd.f32 %v2171_v41, %v2106_v55 }
 0xb0e   :  { %v2193_v6 = vmax.f32 %v2172_v4, 0.0 }
 0xb13   :  { %v2174_v47 = vpop.f32.mrf.mxu1 }
 0xb14   :  { %v2175_v61 = vadd.f32 %v2174_v47, %v2108_v35 }
 0xb16   :  { %v2194_v52 = vmax.f32 %v2175_v61, 0.0 }
 0xb18   :  { %v2202_v20 = vadd.f32 %v2194_v52, %v2999_v3  ;;  %v2213_v3 = vpop.permute.xlu0 %2212 }
 0xb1b   :  { %v2177_v63 = vpop.f32.mrf.mxu1 }
 0xb1c   :  { %v2178_v58 = vadd.f32 %v2177_v63, %v2110_v62 }
 0xb1e   :  { %v2195_v33 = vmax.f32 %v2178_v58, 0.0 }
 0xb23   :  { %v2180_v48 = vpop.f32.mrf.mxu1 }
 0xb24   :  { %v2181_v57 = vadd.f32 %v2180_v48, %v2112_v53 }
 0xb26   :  { %v2196_v30 = vmax.f32 %v2181_v57, 0.0 }
 0xb28   :  { %v2204_v50 = vadd.f32 %v2196_v30, %v2991_v2  ;;  %v2209_v2 = vld [vmem:[#allocation4 + $0x488] sm:$0xff] }
 0xb2b   :  { %v2183_v49 = vpop.f32.mrf.mxu1 }
 0xb2c   :  { %v2184_v42 = vadd.f32 %v2183_v49, %v2114_v11 }
 0xb2e   :  { %v2197_v54 = vmax.f32 %v2184_v42, 0.0 }
 0xb30   :  { %v2205_v15 = vadd.f32 %v2197_v54, %v2987_v44  ;;  %v2208_v44 = vld [vmem:[#allocation4 + $0x480] sm:$0xff] }
 0xb33   :  { %v2186_v0 = vpop.f32.mrf.mxu1 }
 0xb34   :  { %v2187_v43 = vadd.f32 %v2186_v0, %v2116_v40 }
 0xb36   :  { %v2198_v7 = vmax.f32 %v2187_v43, 0.0 }
 0xb38   :  { %v2206_v46 = vadd.f32 %v2198_v7, %v2983_v59  ;;  %v2201_v59 = vadd.f32 %v2193_v6, %v3003_v29 }
 0xb3b   :  { %v2189_v45 = vpop.f32.mrf.mxu1 }
 0xb3c   :  { %v2190_v56 = vadd.f32 %v2189_v45, %v2118_v28 }
 0xb3e   :  { %v2199_v22 = vmax.f32 %v2190_v56, 0.0 }
 0xb40   :  { %v2207_v60 = vadd.f32 %v2199_v22, %v2980_v26  ;;  %v2203_v26 = vadd.f32 %v2195_v33, %v2995_v37 }
 0xb42   :  { %2230 = vmatpush.msrb.mxu2 %v2207_v60 }
 0xb44   :  { %2231 = vmatpush.msrb.mxu2 %v2206_v46 }
 0xb46   :  { %2232 = vmatpush.msrb.mxu2 %v2205_v15 }
 0xb48   :  { %2233 = vmatpush.msrb.mxu2 %v2204_v50 }
 0xb4a   :  { %2234 = vmatpush.msrb.mxu2 %v2203_v26 }
 0xb4c   :  { %2235 = vmatpush.msrb.mxu2 %v2202_v20 }
 0xb4e   :  { %2236 = vmatpush.msrb.mxu2 %v2201_v59 }
 0xb50   :  { %2237 = vmatpush.msrb.mxu2 %v2200_v9 }
 0xb51   :  { %2446 = vmatmul.msk.f32.vlgmr.msrb.gmra.mxu2 %vm526_vm3, %v2208_v44 }
 0xb59   :  { %2447 = vmatmul.msk.f32.gmra.mxu2 %vm526_vm3, %v2209_v2 }
 0xbd4   :  { %v2239_v37 = vpop.f32.mrf.mxu2 }
 0xbd5   :  { %v2240_v31 = vadd.f32 %v2239_v37, %v2211_v10 }
 0xbd7   :  { %2246 = vst.msk [vmem:[%s3053_s2] sm:$0xff] %vm2245_vm5, %v2240_v31 }
 0xbdc   :  { %v2242_v29 = vpop.f32.mrf.mxu2 }
 0xbdd   :  { %v2243_v19 = vadd.f32 %v2242_v29, %v2213_v3 }
 0xbdf   :  { %2247 = vst.msk [vmem:[%s3053_s2 + $0x8] sm:$0xff] %vm2245_vm5, %v2243_v19 }
 0xbe0   :  { %2252 = vsyncpa [#allocation3], 1 }
 0xbe1   :  { %2253 = vsyncpa [#allocation5], 1 }

</bundles_post_ra>
